<compile_context>
chip_gen: v5e
topology: v5e:2x2
jax: 0.10.0
libtpu: 0.0.40
codegen_flags: <defaults>
</compile_context>

<pallas_src>
import functools

import jax
import jax.numpy as jnp
from jax import lax
from jax.experimental import pallas as pl
from jax.experimental.pallas import tpu as pltpu


def _spatial_gate_kernel(x_ref, mask_ref, w1_ref, b1_ref, w2a_ref, t2a_ref,
                         w2b_ref, t2b_ref, w3_ref, t3_ref, o_ref,
                         *, Cr, roll_shifts):
    f32 = jnp.float32
    HIGH = lax.Precision.HIGHEST

    x = x_ref[0].astype(f32)              # (C, HW)  lane-dense
    masks = mask_ref[...]                 # (9, HW)  0/1 boundary masks

    # ---- conv1: 1x1 pointwise C -> Cr as one MXU matmul ----
    y = jnp.dot(w1_ref[...], x, precision=HIGH, preferred_element_type=f32)
    y = y + b1_ref[...]                   # (Cr, HW) + (Cr, 1)

    # ---- dilated 3x3 conv (+ folded BN + ReLU) via roll + mask + VPU FMAs ----
    def dilated_bn_relu(y_in, w_ref, t_ref):
        w = w_ref[...]                                        # (Cr, 9*Cr)
        acc = jnp.broadcast_to(t_ref[...], y_in.shape)        # folded BN shift
        for k, s in enumerate(roll_shifts):
            tap = y_in if s == 0 else pltpu.roll(y_in, shift=s, axis=1)
            tap = tap * masks[k:k + 1]                        # zero-padding
            for ci in range(Cr):
                col = k * Cr + ci
                acc = acc + w[:, col:col + 1] * tap[ci:ci + 1]
        return jnp.maximum(acc, 0.0)

    y = dilated_bn_relu(y, w2a_ref, t2a_ref)
    y = dilated_bn_relu(y, w2b_ref, t2b_ref)

    # ---- conv3: 1x1 Cr -> 1 (+ folded BN) as one MXU matmul ----
    gate = jnp.dot(w3_ref[...], y, precision=HIGH, preferred_element_type=f32)
    gate = gate + t3_ref[...]             # (1, HW)
    o_ref[0] = gate.astype(o_ref.dtype)


def _fold_bn(w, b, gamma, beta, mean, var, eps=1e-5):
    s = gamma / jnp.sqrt(var + eps)
    return w * s[:, None, None, None], (b - mean) * s + beta


def spatial_gate_pallas(x, p, *, dilation=4):
    B, C, H, W = x.shape
    HW = H * W
    Cr = p["w1"].shape[0]

    # Fold inference-mode BatchNorm into the preceding convolutions.
    w2a_s, t2a = _fold_bn(p["w2a"], p["b2a"], p["g2a"], p["be2a"], p["m2a"], p["v2a"])
    w2b_s, t2b = _fold_bn(p["w2b"], p["b2b"], p["g2b"], p["be2b"], p["m2b"], p["v2b"])
    s3 = p["g3"] / jnp.sqrt(p["v3"] + 1e-5)

    # Small VMEM weight matrices for the MXU / VPU formulations.
    w1_mat = p["w1"][:, :, 0, 0].astype(jnp.float32)                     # (Cr, C)
    b1_col = p["b1"].reshape(Cr, 1).astype(jnp.float32)
    # layout: [co, (ki*3+kj)*Cr + ci]
    w2a_mat = w2a_s.transpose(0, 2, 3, 1).reshape(Cr, 9 * Cr).astype(jnp.float32)
    w2b_mat = w2b_s.transpose(0, 2, 3, 1).reshape(Cr, 9 * Cr).astype(jnp.float32)
    t2a_col = t2a.reshape(Cr, 1).astype(jnp.float32)
    t2b_col = t2b.reshape(Cr, 1).astype(jnp.float32)
    w3_mat = (p["w3"][:, :, 0, 0] * s3[:, None]).astype(jnp.float32)     # (1, Cr)
    t3_col = ((p["b3"] - p["m3"]) * s3 + p["be3"]).reshape(1, 1).astype(jnp.float32)

    # Host-precomputed zero-padding masks + static roll shifts for the nine
    # dilated-conv taps on the flattened (H*W) spatial axis.
    lane = jnp.arange(HW, dtype=jnp.int32)
    hh, ww = lane // W, lane % W
    mask_rows, roll_shifts = [], []
    for ki in range(3):
        for kj in range(3):
            sr, sc = (ki - 1) * dilation, (kj - 1) * dilation
            ok = (hh + sr >= 0) & (hh + sr < H) & (ww + sc >= 0) & (ww + sc < W)
            mask_rows.append(ok.astype(jnp.float32))
            roll_shifts.append((-(sr * W + sc)) % HW)
    masks = jnp.stack(mask_rows, axis=0)                                 # (9, HW)

    x_flat = x.reshape(B, C, HW)   # free layout change in HBM

    def const(shape):
        return pl.BlockSpec(shape, lambda b: (0,) * len(shape))

    kernel = functools.partial(_spatial_gate_kernel, Cr=Cr,
                               roll_shifts=tuple(roll_shifts))
    gate = pl.pallas_call(
        kernel,
        out_shape=jax.ShapeDtypeStruct((B, 1, HW), x.dtype),
        grid=(B,),
        in_specs=[
            pl.BlockSpec((1, C, HW), lambda b: (b, 0, 0)),
            const((9, HW)),
            const((Cr, C)), const((Cr, 1)),
            const((Cr, 9 * Cr)), const((Cr, 1)),
            const((Cr, 9 * Cr)), const((Cr, 1)),
            const((1, Cr)), const((1, 1)),
        ],
        out_specs=pl.BlockSpec((1, 1, HW), lambda b: (b, 0, 0)),
        compiler_params=pltpu.CompilerParams(dimension_semantics=("parallel",)),
    )(x_flat, masks, w1_mat, b1_col, w2a_mat, t2a_col, w2b_mat, t2b_col,
      w3_mat, t3_col)

    # expand_as(x): broadcast the single gate map across all C channels.
    return jnp.broadcast_to(gate.reshape(B, 1, H, W), x.shape)


def spatial_gate_ref(x, p, *, dilation=4, eps=1e-5):
    """Pure-JAX reference (eval-mode BN), mirrors the PyTorch forward."""
    HIGH = lax.Precision.HIGHEST

    def conv(y, w, b, dil=1, pad=0):
        out = lax.conv_general_dilated(
            y, w, window_strides=(1, 1),
            padding=((pad, pad), (pad, pad)),
            rhs_dilation=(dil, dil),
            dimension_numbers=("NCHW", "OIHW", "NCHW"),
            precision=HIGH)
        return out + b[None, :, None, None]

    def bn(y, g, be, m, v):
        return (y - m[None, :, None, None]) * (
            g[None, :, None, None] / jnp.sqrt(v[None, :, None, None] + eps)
        ) + be[None, :, None, None]

    y = conv(x, p["w1"], p["b1"])
    y = jax.nn.relu(bn(conv(y, p["w2a"], p["b2a"], dilation, dilation),
                       p["g2a"], p["be2a"], p["m2a"], p["v2a"]))
    y = jax.nn.relu(bn(conv(y, p["w2b"], p["b2b"], dilation, dilation),
                       p["g2b"], p["be2b"], p["m2b"], p["v2b"]))
    y = bn(conv(y, p["w3"], p["b3"]), p["g3"], p["be3"], p["m3"], p["v3"])
    return jnp.broadcast_to(y, x.shape)


def init_params(key, C, reduction=16):
    Cr = C // reduction
    ks = jax.random.split(key, 16)
    n = lambda k, s, sc=0.1: jax.random.normal(k, s, jnp.float32) * sc
    u = lambda k, s: jax.random.uniform(k, s, jnp.float32, 0.5, 1.5)
    p = dict(
        w1=n(ks[0], (Cr, C, 1, 1)), b1=n(ks[1], (Cr,)),
        w2a=n(ks[2], (Cr, Cr, 3, 3), 0.2), b2a=n(ks[3], (Cr,)),
        g2a=u(ks[4], (Cr,)), be2a=n(ks[5], (Cr,)),
        m2a=n(ks[6], (Cr,)), v2a=u(ks[7], (Cr,)),
        w2b=n(ks[8], (Cr, Cr, 3, 3), 0.2), b2b=n(ks[9], (Cr,)),
        g2b=u(ks[10], (Cr,)), be2b=n(ks[11], (Cr,)),
        m2b=n(ks[12], (Cr,)), v2b=u(ks[13], (Cr,)),
        w3=n(ks[14], (1, Cr, 1, 1)), b3=n(ks[15], (1,)),
        g3=jnp.array([1.2], jnp.float32), be3=jnp.array([0.05], jnp.float32),
        m3=jnp.array([0.02], jnp.float32), v3=jnp.array([0.9], jnp.float32),
    )
    return p


if __name__ == "__main__":
    key = jax.random.PRNGKey(0)
    kx, kp = jax.random.split(key)
    # channel=32, reduction=16 -> bottleneck channels = 2; spatial 16x16, batch 2
    B, C, H, W = 2, 32, 16, 16
    x = jax.random.normal(kx, (B, C, H, W), jnp.float32)
    params = init_params(kp, C, reduction=16)

    out = jax.block_until_ready(spatial_gate_pallas(x, params, dilation=4))
    ref = jax.block_until_ready(spatial_gate_ref(x, params, dilation=4))

    assert out.shape == x.shape and out.dtype == x.dtype
    if not jnp.allclose(out, ref, rtol=1e-2, atol=1e-3):
        err = float(jnp.max(jnp.abs(out - ref)))
        raise AssertionError(f"Pallas output mismatch vs reference, max abs err = {err}")
    print("KERNEL_OK")
</pallas_src>

<mosaic_0001>
module attributes {stable_mosaic.version = 11 : i64} {
  func.func @_spatial_gate_kernel(%arg0: i32, %arg1: memref<1x32x256xf32, #tpu.memory_space<vmem>>, %arg2: memref<9x256xf32, #tpu.memory_space<vmem>>, %arg3: memref<2x32xf32, #tpu.memory_space<vmem>>, %arg4: memref<2x1xf32, #tpu.memory_space<vmem>>, %arg5: memref<2x18xf32, #tpu.memory_space<vmem>>, %arg6: memref<2x1xf32, #tpu.memory_space<vmem>>, %arg7: memref<2x18xf32, #tpu.memory_space<vmem>>, %arg8: memref<2x1xf32, #tpu.memory_space<vmem>>, %arg9: memref<1x2xf32, #tpu.memory_space<vmem>>, %arg10: memref<1x1xf32, #tpu.memory_space<vmem>>, %arg11: memref<1x1x256xf32, #tpu.memory_space<vmem>>) attributes {dimension_semantics = [#tpu.dimension_semantics<parallel>], iteration_bounds = array<i64: 2>, scalar_prefetch = 0 : i64, scratch_operands = 0 : i64, tpu.core_type = #tpu.core_type<tc>, window_params = [{transform_indices = @transform_0, window_bounds = array<i64: 1, 32, 256>}, {pipeline_mode = #tpu.pipeline_mode<synchronous>, transform_indices = @transform_1, window_bounds = array<i64: 9, 256>}, {pipeline_mode = #tpu.pipeline_mode<synchronous>, transform_indices = @transform_2, window_bounds = array<i64: 2, 32>}, {pipeline_mode = #tpu.pipeline_mode<synchronous>, transform_indices = @transform_3, window_bounds = array<i64: 2, 1>}, {pipeline_mode = #tpu.pipeline_mode<synchronous>, transform_indices = @transform_4, window_bounds = array<i64: 2, 18>}, {pipeline_mode = #tpu.pipeline_mode<synchronous>, transform_indices = @transform_5, window_bounds = array<i64: 2, 1>}, {pipeline_mode = #tpu.pipeline_mode<synchronous>, transform_indices = @transform_6, window_bounds = array<i64: 2, 18>}, {pipeline_mode = #tpu.pipeline_mode<synchronous>, transform_indices = @transform_7, window_bounds = array<i64: 2, 1>}, {pipeline_mode = #tpu.pipeline_mode<synchronous>, transform_indices = @transform_8, window_bounds = array<i64: 1, 2>}, {pipeline_mode = #tpu.pipeline_mode<synchronous>, transform_indices = @transform_9, window_bounds = array<i64: 1, 1>}, {transform_indices = @transform_10, window_bounds = array<i64: 1, 1, 256>}]} {
    %c0 = arith.constant 0 : index
    %c0_0 = arith.constant 0 : index
    %c0_1 = arith.constant 0 : index
    %0 = vector.load %arg1[%c0, %c0_0, %c0_1] : memref<1x32x256xf32, #tpu.memory_space<vmem>>, vector<1x32x256xf32>
    %1 = vector.shape_cast %0 : vector<1x32x256xf32> to vector<32x256xf32>
    %c0_2 = arith.constant 0 : index
    %c0_3 = arith.constant 0 : index
    %2 = vector.load %arg2[%c0_2, %c0_3] : memref<9x256xf32, #tpu.memory_space<vmem>>, vector<9x256xf32>
    %c0_4 = arith.constant 0 : index
    %c0_5 = arith.constant 0 : index
    %3 = vector.load %arg3[%c0_4, %c0_5] : memref<2x32xf32, #tpu.memory_space<vmem>>, vector<2x32xf32>
    %cst = arith.constant dense<0.000000e+00> : vector<2x256xf32>
    %4 = tpu.matmul %3, %1, %cst {dimension_numbers = #tpu.dot_dimension_numbers<[1], [0], [0], [1], [0, 0, 1, 1], [], []>, precision = #tpu.contract_precision<fp32>} : vector<2x32xf32>, vector<32x256xf32>, vector<2x256xf32> -> vector<2x256xf32>
    %c0_6 = arith.constant 0 : index
    %c0_7 = arith.constant 0 : index
    %5 = vector.load %arg4[%c0_6, %c0_7] : memref<2x1xf32, #tpu.memory_space<vmem>>, vector<2x1xf32>
    %6 = vector.broadcast %5 : vector<2x1xf32> to vector<2x256xf32>
    %7 = arith.addf %4, %6 : vector<2x256xf32>
    %c0_8 = arith.constant 0 : index
    %c0_9 = arith.constant 0 : index
    %8 = vector.load %arg5[%c0_8, %c0_9] : memref<2x18xf32, #tpu.memory_space<vmem>>, vector<2x18xf32>
    %c0_10 = arith.constant 0 : index
    %c0_11 = arith.constant 0 : index
    %9 = vector.load %arg6[%c0_10, %c0_11] : memref<2x1xf32, #tpu.memory_space<vmem>>, vector<2x1xf32>
    %10 = vector.shape_cast %9 : vector<2x1xf32> to vector<2x1xf32>
    %11 = vector.broadcast %10 : vector<2x1xf32> to vector<2x256xf32>
    %c68_i32 = arith.constant 68 : i32
    %12 = tpu.dynamic_rotate %7 by %c68_i32 dim 1 : vector<2x256xf32>, i32 -> vector<2x256xf32>
    %13 = vector.extract_strided_slice %2 {offsets = [0, 0], sizes = [1, 256], strides = [1, 1]} : vector<9x256xf32> to vector<1x256xf32>
    %14 = vector.broadcast %13 : vector<1x256xf32> to vector<2x256xf32>
    %15 = arith.mulf %12, %14 : vector<2x256xf32>
    %16 = vector.extract_strided_slice %8 {offsets = [0, 0], sizes = [2, 1], strides = [1, 1]} : vector<2x18xf32> to vector<2x1xf32>
    %17 = vector.extract_strided_slice %15 {offsets = [0, 0], sizes = [1, 256], strides = [1, 1]} : vector<2x256xf32> to vector<1x256xf32>
    %18 = vector.broadcast %16 : vector<2x1xf32> to vector<2x256xf32>
    %19 = vector.broadcast %17 : vector<1x256xf32> to vector<2x256xf32>
    %20 = arith.mulf %18, %19 : vector<2x256xf32>
    %21 = arith.addf %11, %20 : vector<2x256xf32>
    %22 = vector.extract_strided_slice %8 {offsets = [0, 1], sizes = [2, 1], strides = [1, 1]} : vector<2x18xf32> to vector<2x1xf32>
    %23 = vector.extract_strided_slice %15 {offsets = [1, 0], sizes = [1, 256], strides = [1, 1]} : vector<2x256xf32> to vector<1x256xf32>
    %24 = vector.broadcast %22 : vector<2x1xf32> to vector<2x256xf32>
    %25 = vector.broadcast %23 : vector<1x256xf32> to vector<2x256xf32>
    %26 = arith.mulf %24, %25 : vector<2x256xf32>
    %27 = arith.addf %21, %26 : vector<2x256xf32>
    %c64_i32 = arith.constant 64 : i32
    %28 = tpu.dynamic_rotate %7 by %c64_i32 dim 1 : vector<2x256xf32>, i32 -> vector<2x256xf32>
    %29 = vector.extract_strided_slice %2 {offsets = [1, 0], sizes = [1, 256], strides = [1, 1]} : vector<9x256xf32> to vector<1x256xf32>
    %30 = vector.broadcast %29 : vector<1x256xf32> to vector<2x256xf32>
    %31 = arith.mulf %28, %30 : vector<2x256xf32>
    %32 = vector.extract_strided_slice %8 {offsets = [0, 2], sizes = [2, 1], strides = [1, 1]} : vector<2x18xf32> to vector<2x1xf32>
    %33 = vector.extract_strided_slice %31 {offsets = [0, 0], sizes = [1, 256], strides = [1, 1]} : vector<2x256xf32> to vector<1x256xf32>
    %34 = vector.broadcast %32 : vector<2x1xf32> to vector<2x256xf32>
    %35 = vector.broadcast %33 : vector<1x256xf32> to vector<2x256xf32>
    %36 = arith.mulf %34, %35 : vector<2x256xf32>
    %37 = arith.addf %27, %36 : vector<2x256xf32>
    %38 = vector.extract_strided_slice %8 {offsets = [0, 3], sizes = [2, 1], strides = [1, 1]} : vector<2x18xf32> to vector<2x1xf32>
    %39 = vector.extract_strided_slice %31 {offsets = [1, 0], sizes = [1, 256], strides = [1, 1]} : vector<2x256xf32> to vector<1x256xf32>
    %40 = vector.broadcast %38 : vector<2x1xf32> to vector<2x256xf32>
    %41 = vector.broadcast %39 : vector<1x256xf32> to vector<2x256xf32>
    %42 = arith.mulf %40, %41 : vector<2x256xf32>
    %43 = arith.addf %37, %42 : vector<2x256xf32>
    %c60_i32 = arith.constant 60 : i32
    %44 = tpu.dynamic_rotate %7 by %c60_i32 dim 1 : vector<2x256xf32>, i32 -> vector<2x256xf32>
    %45 = vector.extract_strided_slice %2 {offsets = [2, 0], sizes = [1, 256], strides = [1, 1]} : vector<9x256xf32> to vector<1x256xf32>
    %46 = vector.broadcast %45 : vector<1x256xf32> to vector<2x256xf32>
    %47 = arith.mulf %44, %46 : vector<2x256xf32>
    %48 = vector.extract_strided_slice %8 {offsets = [0, 4], sizes = [2, 1], strides = [1, 1]} : vector<2x18xf32> to vector<2x1xf32>
    %49 = vector.extract_strided_slice %47 {offsets = [0, 0], sizes = [1, 256], strides = [1, 1]} : vector<2x256xf32> to vector<1x256xf32>
    %50 = vector.broadcast %48 : vector<2x1xf32> to vector<2x256xf32>
    %51 = vector.broadcast %49 : vector<1x256xf32> to vector<2x256xf32>
    %52 = arith.mulf %50, %51 : vector<2x256xf32>
    %53 = arith.addf %43, %52 : vector<2x256xf32>
    %54 = vector.extract_strided_slice %8 {offsets = [0, 5], sizes = [2, 1], strides = [1, 1]} : vector<2x18xf32> to vector<2x1xf32>
    %55 = vector.extract_strided_slice %47 {offsets = [1, 0], sizes = [1, 256], strides = [1, 1]} : vector<2x256xf32> to vector<1x256xf32>
    %56 = vector.broadcast %54 : vector<2x1xf32> to vector<2x256xf32>
    %57 = vector.broadcast %55 : vector<1x256xf32> to vector<2x256xf32>
    %58 = arith.mulf %56, %57 : vector<2x256xf32>
    %59 = arith.addf %53, %58 : vector<2x256xf32>
    %c4_i32 = arith.constant 4 : i32
    %60 = tpu.dynamic_rotate %7 by %c4_i32 dim 1 : vector<2x256xf32>, i32 -> vector<2x256xf32>
    %61 = vector.extract_strided_slice %2 {offsets = [3, 0], sizes = [1, 256], strides = [1, 1]} : vector<9x256xf32> to vector<1x256xf32>
    %62 = vector.broadcast %61 : vector<1x256xf32> to vector<2x256xf32>
    %63 = arith.mulf %60, %62 : vector<2x256xf32>
    %64 = vector.extract_strided_slice %8 {offsets = [0, 6], sizes = [2, 1], strides = [1, 1]} : vector<2x18xf32> to vector<2x1xf32>
    %65 = vector.extract_strided_slice %63 {offsets = [0, 0], sizes = [1, 256], strides = [1, 1]} : vector<2x256xf32> to vector<1x256xf32>
    %66 = vector.broadcast %64 : vector<2x1xf32> to vector<2x256xf32>
    %67 = vector.broadcast %65 : vector<1x256xf32> to vector<2x256xf32>
    %68 = arith.mulf %66, %67 : vector<2x256xf32>
    %69 = arith.addf %59, %68 : vector<2x256xf32>
    %70 = vector.extract_strided_slice %8 {offsets = [0, 7], sizes = [2, 1], strides = [1, 1]} : vector<2x18xf32> to vector<2x1xf32>
    %71 = vector.extract_strided_slice %63 {offsets = [1, 0], sizes = [1, 256], strides = [1, 1]} : vector<2x256xf32> to vector<1x256xf32>
    %72 = vector.broadcast %70 : vector<2x1xf32> to vector<2x256xf32>
    %73 = vector.broadcast %71 : vector<1x256xf32> to vector<2x256xf32>
    %74 = arith.mulf %72, %73 : vector<2x256xf32>
    %75 = arith.addf %69, %74 : vector<2x256xf32>
    %76 = vector.extract_strided_slice %2 {offsets = [4, 0], sizes = [1, 256], strides = [1, 1]} : vector<9x256xf32> to vector<1x256xf32>
    %77 = vector.broadcast %76 : vector<1x256xf32> to vector<2x256xf32>
    %78 = arith.mulf %7, %77 : vector<2x256xf32>
    %79 = vector.extract_strided_slice %8 {offsets = [0, 8], sizes = [2, 1], strides = [1, 1]} : vector<2x18xf32> to vector<2x1xf32>
    %80 = vector.extract_strided_slice %78 {offsets = [0, 0], sizes = [1, 256], strides = [1, 1]} : vector<2x256xf32> to vector<1x256xf32>
    %81 = vector.broadcast %79 : vector<2x1xf32> to vector<2x256xf32>
    %82 = vector.broadcast %80 : vector<1x256xf32> to vector<2x256xf32>
    %83 = arith.mulf %81, %82 : vector<2x256xf32>
    %84 = arith.addf %75, %83 : vector<2x256xf32>
    %85 = vector.extract_strided_slice %8 {offsets = [0, 9], sizes = [2, 1], strides = [1, 1]} : vector<2x18xf32> to vector<2x1xf32>
    %86 = vector.extract_strided_slice %78 {offsets = [1, 0], sizes = [1, 256], strides = [1, 1]} : vector<2x256xf32> to vector<1x256xf32>
    %87 = vector.broadcast %85 : vector<2x1xf32> to vector<2x256xf32>
    %88 = vector.broadcast %86 : vector<1x256xf32> to vector<2x256xf32>
    %89 = arith.mulf %87, %88 : vector<2x256xf32>
    %90 = arith.addf %84, %89 : vector<2x256xf32>
    %c252_i32 = arith.constant 252 : i32
    %91 = tpu.dynamic_rotate %7 by %c252_i32 dim 1 : vector<2x256xf32>, i32 -> vector<2x256xf32>
    %92 = vector.extract_strided_slice %2 {offsets = [5, 0], sizes = [1, 256], strides = [1, 1]} : vector<9x256xf32> to vector<1x256xf32>
    %93 = vector.broadcast %92 : vector<1x256xf32> to vector<2x256xf32>
    %94 = arith.mulf %91, %93 : vector<2x256xf32>
    %95 = vector.extract_strided_slice %8 {offsets = [0, 10], sizes = [2, 1], strides = [1, 1]} : vector<2x18xf32> to vector<2x1xf32>
    %96 = vector.extract_strided_slice %94 {offsets = [0, 0], sizes = [1, 256], strides = [1, 1]} : vector<2x256xf32> to vector<1x256xf32>
    %97 = vector.broadcast %95 : vector<2x1xf32> to vector<2x256xf32>
    %98 = vector.broadcast %96 : vector<1x256xf32> to vector<2x256xf32>
    %99 = arith.mulf %97, %98 : vector<2x256xf32>
    %100 = arith.addf %90, %99 : vector<2x256xf32>
    %101 = vector.extract_strided_slice %8 {offsets = [0, 11], sizes = [2, 1], strides = [1, 1]} : vector<2x18xf32> to vector<2x1xf32>
    %102 = vector.extract_strided_slice %94 {offsets = [1, 0], sizes = [1, 256], strides = [1, 1]} : vector<2x256xf32> to vector<1x256xf32>
    %103 = vector.broadcast %101 : vector<2x1xf32> to vector<2x256xf32>
    %104 = vector.broadcast %102 : vector<1x256xf32> to vector<2x256xf32>
    %105 = arith.mulf %103, %104 : vector<2x256xf32>
    %106 = arith.addf %100, %105 : vector<2x256xf32>
    %c196_i32 = arith.constant 196 : i32
    %107 = tpu.dynamic_rotate %7 by %c196_i32 dim 1 : vector<2x256xf32>, i32 -> vector<2x256xf32>
    %108 = vector.extract_strided_slice %2 {offsets = [6, 0], sizes = [1, 256], strides = [1, 1]} : vector<9x256xf32> to vector<1x256xf32>
    %109 = vector.broadcast %108 : vector<1x256xf32> to vector<2x256xf32>
    %110 = arith.mulf %107, %109 : vector<2x256xf32>
    %111 = vector.extract_strided_slice %8 {offsets = [0, 12], sizes = [2, 1], strides = [1, 1]} : vector<2x18xf32> to vector<2x1xf32>
    %112 = vector.extract_strided_slice %110 {offsets = [0, 0], sizes = [1, 256], strides = [1, 1]} : vector<2x256xf32> to vector<1x256xf32>
    %113 = vector.broadcast %111 : vector<2x1xf32> to vector<2x256xf32>
    %114 = vector.broadcast %112 : vector<1x256xf32> to vector<2x256xf32>
    %115 = arith.mulf %113, %114 : vector<2x256xf32>
    %116 = arith.addf %106, %115 : vector<2x256xf32>
    %117 = vector.extract_strided_slice %8 {offsets = [0, 13], sizes = [2, 1], strides = [1, 1]} : vector<2x18xf32> to vector<2x1xf32>
    %118 = vector.extract_strided_slice %110 {offsets = [1, 0], sizes = [1, 256], strides = [1, 1]} : vector<2x256xf32> to vector<1x256xf32>
    %119 = vector.broadcast %117 : vector<2x1xf32> to vector<2x256xf32>
    %120 = vector.broadcast %118 : vector<1x256xf32> to vector<2x256xf32>
    %121 = arith.mulf %119, %120 : vector<2x256xf32>
    %122 = arith.addf %116, %121 : vector<2x256xf32>
    %c192_i32 = arith.constant 192 : i32
    %123 = tpu.dynamic_rotate %7 by %c192_i32 dim 1 : vector<2x256xf32>, i32 -> vector<2x256xf32>
    %124 = vector.extract_strided_slice %2 {offsets = [7, 0], sizes = [1, 256], strides = [1, 1]} : vector<9x256xf32> to vector<1x256xf32>
    %125 = vector.broadcast %124 : vector<1x256xf32> to vector<2x256xf32>
    %126 = arith.mulf %123, %125 : vector<2x256xf32>
    %127 = vector.extract_strided_slice %8 {offsets = [0, 14], sizes = [2, 1], strides = [1, 1]} : vector<2x18xf32> to vector<2x1xf32>
    %128 = vector.extract_strided_slice %126 {offsets = [0, 0], sizes = [1, 256], strides = [1, 1]} : vector<2x256xf32> to vector<1x256xf32>
    %129 = vector.broadcast %127 : vector<2x1xf32> to vector<2x256xf32>
    %130 = vector.broadcast %128 : vector<1x256xf32> to vector<2x256xf32>
    %131 = arith.mulf %129, %130 : vector<2x256xf32>
    %132 = arith.addf %122, %131 : vector<2x256xf32>
    %133 = vector.extract_strided_slice %8 {offsets = [0, 15], sizes = [2, 1], strides = [1, 1]} : vector<2x18xf32> to vector<2x1xf32>
    %134 = vector.extract_strided_slice %126 {offsets = [1, 0], sizes = [1, 256], strides = [1, 1]} : vector<2x256xf32> to vector<1x256xf32>
    %135 = vector.broadcast %133 : vector<2x1xf32> to vector<2x256xf32>
    %136 = vector.broadcast %134 : vector<1x256xf32> to vector<2x256xf32>
    %137 = arith.mulf %135, %136 : vector<2x256xf32>
    %138 = arith.addf %132, %137 : vector<2x256xf32>
    %c188_i32 = arith.constant 188 : i32
    %139 = tpu.dynamic_rotate %7 by %c188_i32 dim 1 : vector<2x256xf32>, i32 -> vector<2x256xf32>
    %140 = vector.extract_strided_slice %2 {offsets = [8, 0], sizes = [1, 256], strides = [1, 1]} : vector<9x256xf32> to vector<1x256xf32>
    %141 = vector.broadcast %140 : vector<1x256xf32> to vector<2x256xf32>
    %142 = arith.mulf %139, %141 : vector<2x256xf32>
    %143 = vector.extract_strided_slice %8 {offsets = [0, 16], sizes = [2, 1], strides = [1, 1]} : vector<2x18xf32> to vector<2x1xf32>
    %144 = vector.extract_strided_slice %142 {offsets = [0, 0], sizes = [1, 256], strides = [1, 1]} : vector<2x256xf32> to vector<1x256xf32>
    %145 = vector.broadcast %143 : vector<2x1xf32> to vector<2x256xf32>
    %146 = vector.broadcast %144 : vector<1x256xf32> to vector<2x256xf32>
    %147 = arith.mulf %145, %146 : vector<2x256xf32>
    %148 = arith.addf %138, %147 : vector<2x256xf32>
    %149 = vector.extract_strided_slice %8 {offsets = [0, 17], sizes = [2, 1], strides = [1, 1]} : vector<2x18xf32> to vector<2x1xf32>
    %150 = vector.extract_strided_slice %142 {offsets = [1, 0], sizes = [1, 256], strides = [1, 1]} : vector<2x256xf32> to vector<1x256xf32>
    %151 = vector.broadcast %149 : vector<2x1xf32> to vector<2x256xf32>
    %152 = vector.broadcast %150 : vector<1x256xf32> to vector<2x256xf32>
    %153 = arith.mulf %151, %152 : vector<2x256xf32>
    %154 = arith.addf %148, %153 : vector<2x256xf32>
    %cst_12 = arith.constant 0.000000e+00 : f32
    %155 = vector.broadcast %cst_12 : f32 to vector<2x256xf32>
    %156 = arith.maximumf %154, %155 : vector<2x256xf32>
    %c0_13 = arith.constant 0 : index
    %c0_14 = arith.constant 0 : index
    %157 = vector.load %arg7[%c0_13, %c0_14] : memref<2x18xf32, #tpu.memory_space<vmem>>, vector<2x18xf32>
    %c0_15 = arith.constant 0 : index
    %c0_16 = arith.constant 0 : index
    %158 = vector.load %arg8[%c0_15, %c0_16] : memref<2x1xf32, #tpu.memory_space<vmem>>, vector<2x1xf32>
    %159 = vector.shape_cast %158 : vector<2x1xf32> to vector<2x1xf32>
    %160 = vector.broadcast %159 : vector<2x1xf32> to vector<2x256xf32>
    %c68_i32_17 = arith.constant 68 : i32
    %161 = tpu.dynamic_rotate %156 by %c68_i32_17 dim 1 : vector<2x256xf32>, i32 -> vector<2x256xf32>
    %162 = vector.extract_strided_slice %2 {offsets = [0, 0], sizes = [1, 256], strides = [1, 1]} : vector<9x256xf32> to vector<1x256xf32>
    %163 = vector.broadcast %162 : vector<1x256xf32> to vector<2x256xf32>
    %164 = arith.mulf %161, %163 : vector<2x256xf32>
    %165 = vector.extract_strided_slice %157 {offsets = [0, 0], sizes = [2, 1], strides = [1, 1]} : vector<2x18xf32> to vector<2x1xf32>
    %166 = vector.extract_strided_slice %164 {offsets = [0, 0], sizes = [1, 256], strides = [1, 1]} : vector<2x256xf32> to vector<1x256xf32>
    %167 = vector.broadcast %165 : vector<2x1xf32> to vector<2x256xf32>
    %168 = vector.broadcast %166 : vector<1x256xf32> to vector<2x256xf32>
    %169 = arith.mulf %167, %168 : vector<2x256xf32>
    %170 = arith.addf %160, %169 : vector<2x256xf32>
    %171 = vector.extract_strided_slice %157 {offsets = [0, 1], sizes = [2, 1], strides = [1, 1]} : vector<2x18xf32> to vector<2x1xf32>
    %172 = vector.extract_strided_slice %164 {offsets = [1, 0], sizes = [1, 256], strides = [1, 1]} : vector<2x256xf32> to vector<1x256xf32>
    %173 = vector.broadcast %171 : vector<2x1xf32> to vector<2x256xf32>
    %174 = vector.broadcast %172 : vector<1x256xf32> to vector<2x256xf32>
    %175 = arith.mulf %173, %174 : vector<2x256xf32>
    %176 = arith.addf %170, %175 : vector<2x256xf32>
    %c64_i32_18 = arith.constant 64 : i32
    %177 = tpu.dynamic_rotate %156 by %c64_i32_18 dim 1 : vector<2x256xf32>, i32 -> vector<2x256xf32>
    %178 = vector.extract_strided_slice %2 {offsets = [1, 0], sizes = [1, 256], strides = [1, 1]} : vector<9x256xf32> to vector<1x256xf32>
    %179 = vector.broadcast %178 : vector<1x256xf32> to vector<2x256xf32>
    %180 = arith.mulf %177, %179 : vector<2x256xf32>
    %181 = vector.extract_strided_slice %157 {offsets = [0, 2], sizes = [2, 1], strides = [1, 1]} : vector<2x18xf32> to vector<2x1xf32>
    %182 = vector.extract_strided_slice %180 {offsets = [0, 0], sizes = [1, 256], strides = [1, 1]} : vector<2x256xf32> to vector<1x256xf32>
    %183 = vector.broadcast %181 : vector<2x1xf32> to vector<2x256xf32>
    %184 = vector.broadcast %182 : vector<1x256xf32> to vector<2x256xf32>
    %185 = arith.mulf %183, %184 : vector<2x256xf32>
    %186 = arith.addf %176, %185 : vector<2x256xf32>
    %187 = vector.extract_strided_slice %157 {offsets = [0, 3], sizes = [2, 1], strides = [1, 1]} : vector<2x18xf32> to vector<2x1xf32>
    %188 = vector.extract_strided_slice %180 {offsets = [1, 0], sizes = [1, 256], strides = [1, 1]} : vector<2x256xf32> to vector<1x256xf32>
    %189 = vector.broadcast %187 : vector<2x1xf32> to vector<2x256xf32>
    %190 = vector.broadcast %188 : vector<1x256xf32> to vector<2x256xf32>
    %191 = arith.mulf %189, %190 : vector<2x256xf32>
    %192 = arith.addf %186, %191 : vector<2x256xf32>
    %c60_i32_19 = arith.constant 60 : i32
    %193 = tpu.dynamic_rotate %156 by %c60_i32_19 dim 1 : vector<2x256xf32>, i32 -> vector<2x256xf32>
    %194 = vector.extract_strided_slice %2 {offsets = [2, 0], sizes = [1, 256], strides = [1, 1]} : vector<9x256xf32> to vector<1x256xf32>
    %195 = vector.broadcast %194 : vector<1x256xf32> to vector<2x256xf32>
    %196 = arith.mulf %193, %195 : vector<2x256xf32>
    %197 = vector.extract_strided_slice %157 {offsets = [0, 4], sizes = [2, 1], strides = [1, 1]} : vector<2x18xf32> to vector<2x1xf32>
    %198 = vector.extract_strided_slice %196 {offsets = [0, 0], sizes = [1, 256], strides = [1, 1]} : vector<2x256xf32> to vector<1x256xf32>
    %199 = vector.broadcast %197 : vector<2x1xf32> to vector<2x256xf32>
    %200 = vector.broadcast %198 : vector<1x256xf32> to vector<2x256xf32>
    %201 = arith.mulf %199, %200 : vector<2x256xf32>
    %202 = arith.addf %192, %201 : vector<2x256xf32>
    %203 = vector.extract_strided_slice %157 {offsets = [0, 5], sizes = [2, 1], strides = [1, 1]} : vector<2x18xf32> to vector<2x1xf32>
    %204 = vector.extract_strided_slice %196 {offsets = [1, 0], sizes = [1, 256], strides = [1, 1]} : vector<2x256xf32> to vector<1x256xf32>
    %205 = vector.broadcast %203 : vector<2x1xf32> to vector<2x256xf32>
    %206 = vector.broadcast %204 : vector<1x256xf32> to vector<2x256xf32>
    %207 = arith.mulf %205, %206 : vector<2x256xf32>
    %208 = arith.addf %202, %207 : vector<2x256xf32>
    %c4_i32_20 = arith.constant 4 : i32
    %209 = tpu.dynamic_rotate %156 by %c4_i32_20 dim 1 : vector<2x256xf32>, i32 -> vector<2x256xf32>
    %210 = vector.extract_strided_slice %2 {offsets = [3, 0], sizes = [1, 256], strides = [1, 1]} : vector<9x256xf32> to vector<1x256xf32>
    %211 = vector.broadcast %210 : vector<1x256xf32> to vector<2x256xf32>
    %212 = arith.mulf %209, %211 : vector<2x256xf32>
    %213 = vector.extract_strided_slice %157 {offsets = [0, 6], sizes = [2, 1], strides = [1, 1]} : vector<2x18xf32> to vector<2x1xf32>
    %214 = vector.extract_strided_slice %212 {offsets = [0, 0], sizes = [1, 256], strides = [1, 1]} : vector<2x256xf32> to vector<1x256xf32>
    %215 = vector.broadcast %213 : vector<2x1xf32> to vector<2x256xf32>
    %216 = vector.broadcast %214 : vector<1x256xf32> to vector<2x256xf32>
    %217 = arith.mulf %215, %216 : vector<2x256xf32>
    %218 = arith.addf %208, %217 : vector<2x256xf32>
    %219 = vector.extract_strided_slice %157 {offsets = [0, 7], sizes = [2, 1], strides = [1, 1]} : vector<2x18xf32> to vector<2x1xf32>
    %220 = vector.extract_strided_slice %212 {offsets = [1, 0], sizes = [1, 256], strides = [1, 1]} : vector<2x256xf32> to vector<1x256xf32>
    %221 = vector.broadcast %219 : vector<2x1xf32> to vector<2x256xf32>
    %222 = vector.broadcast %220 : vector<1x256xf32> to vector<2x256xf32>
    %223 = arith.mulf %221, %222 : vector<2x256xf32>
    %224 = arith.addf %218, %223 : vector<2x256xf32>
    %225 = vector.extract_strided_slice %2 {offsets = [4, 0], sizes = [1, 256], strides = [1, 1]} : vector<9x256xf32> to vector<1x256xf32>
    %226 = vector.broadcast %225 : vector<1x256xf32> to vector<2x256xf32>
    %227 = arith.mulf %156, %226 : vector<2x256xf32>
    %228 = vector.extract_strided_slice %157 {offsets = [0, 8], sizes = [2, 1], strides = [1, 1]} : vector<2x18xf32> to vector<2x1xf32>
    %229 = vector.extract_strided_slice %227 {offsets = [0, 0], sizes = [1, 256], strides = [1, 1]} : vector<2x256xf32> to vector<1x256xf32>
    %230 = vector.broadcast %228 : vector<2x1xf32> to vector<2x256xf32>
    %231 = vector.broadcast %229 : vector<1x256xf32> to vector<2x256xf32>
    %232 = arith.mulf %230, %231 : vector<2x256xf32>
    %233 = arith.addf %224, %232 : vector<2x256xf32>
    %234 = vector.extract_strided_slice %157 {offsets = [0, 9], sizes = [2, 1], strides = [1, 1]} : vector<2x18xf32> to vector<2x1xf32>
    %235 = vector.extract_strided_slice %227 {offsets = [1, 0], sizes = [1, 256], strides = [1, 1]} : vector<2x256xf32> to vector<1x256xf32>
    %236 = vector.broadcast %234 : vector<2x1xf32> to vector<2x256xf32>
    %237 = vector.broadcast %235 : vector<1x256xf32> to vector<2x256xf32>
    %238 = arith.mulf %236, %237 : vector<2x256xf32>
    %239 = arith.addf %233, %238 : vector<2x256xf32>
    %c252_i32_21 = arith.constant 252 : i32
    %240 = tpu.dynamic_rotate %156 by %c252_i32_21 dim 1 : vector<2x256xf32>, i32 -> vector<2x256xf32>
    %241 = vector.extract_strided_slice %2 {offsets = [5, 0], sizes = [1, 256], strides = [1, 1]} : vector<9x256xf32> to vector<1x256xf32>
    %242 = vector.broadcast %241 : vector<1x256xf32> to vector<2x256xf32>
    %243 = arith.mulf %240, %242 : vector<2x256xf32>
    %244 = vector.extract_strided_slice %157 {offsets = [0, 10], sizes = [2, 1], strides = [1, 1]} : vector<2x18xf32> to vector<2x1xf32>
    %245 = vector.extract_strided_slice %243 {offsets = [0, 0], sizes = [1, 256], strides = [1, 1]} : vector<2x256xf32> to vector<1x256xf32>
    %246 = vector.broadcast %244 : vector<2x1xf32> to vector<2x256xf32>
    %247 = vector.broadcast %245 : vector<1x256xf32> to vector<2x256xf32>
    %248 = arith.mulf %246, %247 : vector<2x256xf32>
    %249 = arith.addf %239, %248 : vector<2x256xf32>
    %250 = vector.extract_strided_slice %157 {offsets = [0, 11], sizes = [2, 1], strides = [1, 1]} : vector<2x18xf32> to vector<2x1xf32>
    %251 = vector.extract_strided_slice %243 {offsets = [1, 0], sizes = [1, 256], strides = [1, 1]} : vector<2x256xf32> to vector<1x256xf32>
    %252 = vector.broadcast %250 : vector<2x1xf32> to vector<2x256xf32>
    %253 = vector.broadcast %251 : vector<1x256xf32> to vector<2x256xf32>
    %254 = arith.mulf %252, %253 : vector<2x256xf32>
    %255 = arith.addf %249, %254 : vector<2x256xf32>
    %c196_i32_22 = arith.constant 196 : i32
    %256 = tpu.dynamic_rotate %156 by %c196_i32_22 dim 1 : vector<2x256xf32>, i32 -> vector<2x256xf32>
    %257 = vector.extract_strided_slice %2 {offsets = [6, 0], sizes = [1, 256], strides = [1, 1]} : vector<9x256xf32> to vector<1x256xf32>
    %258 = vector.broadcast %257 : vector<1x256xf32> to vector<2x256xf32>
    %259 = arith.mulf %256, %258 : vector<2x256xf32>
    %260 = vector.extract_strided_slice %157 {offsets = [0, 12], sizes = [2, 1], strides = [1, 1]} : vector<2x18xf32> to vector<2x1xf32>
    %261 = vector.extract_strided_slice %259 {offsets = [0, 0], sizes = [1, 256], strides = [1, 1]} : vector<2x256xf32> to vector<1x256xf32>
    %262 = vector.broadcast %260 : vector<2x1xf32> to vector<2x256xf32>
    %263 = vector.broadcast %261 : vector<1x256xf32> to vector<2x256xf32>
    %264 = arith.mulf %262, %263 : vector<2x256xf32>
    %265 = arith.addf %255, %264 : vector<2x256xf32>
    %266 = vector.extract_strided_slice %157 {offsets = [0, 13], sizes = [2, 1], strides = [1, 1]} : vector<2x18xf32> to vector<2x1xf32>
    %267 = vector.extract_strided_slice %259 {offsets = [1, 0], sizes = [1, 256], strides = [1, 1]} : vector<2x256xf32> to vector<1x256xf32>
    %268 = vector.broadcast %266 : vector<2x1xf32> to vector<2x256xf32>
    %269 = vector.broadcast %267 : vector<1x256xf32> to vector<2x256xf32>
    %270 = arith.mulf %268, %269 : vector<2x256xf32>
    %271 = arith.addf %265, %270 : vector<2x256xf32>
    %c192_i32_23 = arith.constant 192 : i32
    %272 = tpu.dynamic_rotate %156 by %c192_i32_23 dim 1 : vector<2x256xf32>, i32 -> vector<2x256xf32>
    %273 = vector.extract_strided_slice %2 {offsets = [7, 0], sizes = [1, 256], strides = [1, 1]} : vector<9x256xf32> to vector<1x256xf32>
    %274 = vector.broadcast %273 : vector<1x256xf32> to vector<2x256xf32>
    %275 = arith.mulf %272, %274 : vector<2x256xf32>
    %276 = vector.extract_strided_slice %157 {offsets = [0, 14], sizes = [2, 1], strides = [1, 1]} : vector<2x18xf32> to vector<2x1xf32>
    %277 = vector.extract_strided_slice %275 {offsets = [0, 0], sizes = [1, 256], strides = [1, 1]} : vector<2x256xf32> to vector<1x256xf32>
    %278 = vector.broadcast %276 : vector<2x1xf32> to vector<2x256xf32>
    %279 = vector.broadcast %277 : vector<1x256xf32> to vector<2x256xf32>
    %280 = arith.mulf %278, %279 : vector<2x256xf32>
    %281 = arith.addf %271, %280 : vector<2x256xf32>
    %282 = vector.extract_strided_slice %157 {offsets = [0, 15], sizes = [2, 1], strides = [1, 1]} : vector<2x18xf32> to vector<2x1xf32>
    %283 = vector.extract_strided_slice %275 {offsets = [1, 0], sizes = [1, 256], strides = [1, 1]} : vector<2x256xf32> to vector<1x256xf32>
    %284 = vector.broadcast %282 : vector<2x1xf32> to vector<2x256xf32>
    %285 = vector.broadcast %283 : vector<1x256xf32> to vector<2x256xf32>
    %286 = arith.mulf %284, %285 : vector<2x256xf32>
    %287 = arith.addf %281, %286 : vector<2x256xf32>
    %c188_i32_24 = arith.constant 188 : i32
    %288 = tpu.dynamic_rotate %156 by %c188_i32_24 dim 1 : vector<2x256xf32>, i32 -> vector<2x256xf32>
    %289 = vector.extract_strided_slice %2 {offsets = [8, 0], sizes = [1, 256], strides = [1, 1]} : vector<9x256xf32> to vector<1x256xf32>
    %290 = vector.broadcast %289 : vector<1x256xf32> to vector<2x256xf32>
    %291 = arith.mulf %288, %290 : vector<2x256xf32>
    %292 = vector.extract_strided_slice %157 {offsets = [0, 16], sizes = [2, 1], strides = [1, 1]} : vector<2x18xf32> to vector<2x1xf32>
    %293 = vector.extract_strided_slice %291 {offsets = [0, 0], sizes = [1, 256], strides = [1, 1]} : vector<2x256xf32> to vector<1x256xf32>
    %294 = vector.broadcast %292 : vector<2x1xf32> to vector<2x256xf32>
    %295 = vector.broadcast %293 : vector<1x256xf32> to vector<2x256xf32>
    %296 = arith.mulf %294, %295 : vector<2x256xf32>
    %297 = arith.addf %287, %296 : vector<2x256xf32>
    %298 = vector.extract_strided_slice %157 {offsets = [0, 17], sizes = [2, 1], strides = [1, 1]} : vector<2x18xf32> to vector<2x1xf32>
    %299 = vector.extract_strided_slice %291 {offsets = [1, 0], sizes = [1, 256], strides = [1, 1]} : vector<2x256xf32> to vector<1x256xf32>
    %300 = vector.broadcast %298 : vector<2x1xf32> to vector<2x256xf32>
    %301 = vector.broadcast %299 : vector<1x256xf32> to vector<2x256xf32>
    %302 = arith.mulf %300, %301 : vector<2x256xf32>
    %303 = arith.addf %297, %302 : vector<2x256xf32>
    %cst_25 = arith.constant 0.000000e+00 : f32
    %304 = vector.broadcast %cst_25 : f32 to vector<2x256xf32>
    %305 = arith.maximumf %303, %304 : vector<2x256xf32>
    %c0_26 = arith.constant 0 : index
    %c0_27 = arith.constant 0 : index
    %306 = vector.load %arg9[%c0_26, %c0_27] : memref<1x2xf32, #tpu.memory_space<vmem>>, vector<1x2xf32>
    %cst_28 = arith.constant dense<0.000000e+00> : vector<1x256xf32>
    %307 = tpu.matmul %306, %305, %cst_28 {dimension_numbers = #tpu.dot_dimension_numbers<[1], [0], [0], [1], [0, 0, 1, 1], [], []>, precision = #tpu.contract_precision<fp32>} : vector<1x2xf32>, vector<2x256xf32>, vector<1x256xf32> -> vector<1x256xf32>
    %c0_29 = arith.constant 0 : index
    %c0_30 = arith.constant 0 : index
    %308 = vector.load %arg10[%c0_29, %c0_30] : memref<1x1xf32, #tpu.memory_space<vmem>>, vector<1x1xf32>
    %309 = vector.broadcast %308 : vector<1x1xf32> to vector<1x256xf32>
    %310 = arith.addf %307, %309 : vector<1x256xf32>
    %c0_31 = arith.constant 0 : index
    %c0_32 = arith.constant 0 : index
    %c0_33 = arith.constant 0 : index
    %311 = vector.load %arg11[%c0_31, %c0_32, %c0_33] : memref<1x1x256xf32, #tpu.memory_space<vmem>>, vector<1x1x256xf32>
    %312 = vector.shape_cast %311 : vector<1x1x256xf32> to vector<1x256xf32>
    %313 = vector.shape_cast %310 : vector<1x256xf32> to vector<1x1x256xf32>
    tpu.vector_store %arg11[%c0_31, %c0_32, %c0_33], %313 {strides = array<i32>} : memref<1x1x256xf32, #tpu.memory_space<vmem>>, vector<1x1x256xf32>,
    return
  }
  func.func @transform_0(%arg0: i32) -> (i32, i32, i32) {
    %c0_i32 = arith.constant 0 : i32
    %c0_i32_0 = arith.constant 0 : i32
    %c0_i32_1 = arith.constant 0 : i32
    return %arg0, %c0_i32, %c0_i32_0 : i32, i32, i32
  }
  func.func @transform_1(%arg0: i32) -> (i32, i32) {
    %c0_i32 = arith.constant 0 : i32
    %c0_i32_0 = arith.constant 0 : i32
    %c0_i32_1 = arith.constant 0 : i32
    return %c0_i32, %c0_i32_0 : i32, i32
  }
  func.func @transform_2(%arg0: i32) -> (i32, i32) {
    %c0_i32 = arith.constant 0 : i32
    %c0_i32_0 = arith.constant 0 : i32
    %c0_i32_1 = arith.constant 0 : i32
    return %c0_i32, %c0_i32_0 : i32, i32
  }
  func.func @transform_3(%arg0: i32) -> (i32, i32) {
    %c0_i32 = arith.constant 0 : i32
    %c0_i32_0 = arith.constant 0 : i32
    %c0_i32_1 = arith.constant 0 : i32
    return %c0_i32, %c0_i32_0 : i32, i32
  }
  func.func @transform_4(%arg0: i32) -> (i32, i32) {
    %c0_i32 = arith.constant 0 : i32
    %c0_i32_0 = arith.constant 0 : i32
    %c0_i32_1 = arith.constant 0 : i32
    return %c0_i32, %c0_i32_0 : i32, i32
  }
  func.func @transform_5(%arg0: i32) -> (i32, i32) {
    %c0_i32 = arith.constant 0 : i32
    %c0_i32_0 = arith.constant 0 : i32
    %c0_i32_1 = arith.constant 0 : i32
    return %c0_i32, %c0_i32_0 : i32, i32
  }
  func.func @transform_6(%arg0: i32) -> (i32, i32) {
    %c0_i32 = arith.constant 0 : i32
    %c0_i32_0 = arith.constant 0 : i32
    %c0_i32_1 = arith.constant 0 : i32
    return %c0_i32, %c0_i32_0 : i32, i32
  }
  func.func @transform_7(%arg0: i32) -> (i32, i32) {
    %c0_i32 = arith.constant 0 : i32
    %c0_i32_0 = arith.constant 0 : i32
    %c0_i32_1 = arith.constant 0 : i32
    return %c0_i32, %c0_i32_0 : i32, i32
  }
  func.func @transform_8(%arg0: i32) -> (i32, i32) {
    %c0_i32 = arith.constant 0 : i32
    %c0_i32_0 = arith.constant 0 : i32
    %c0_i32_1 = arith.constant 0 : i32
    return %c0_i32, %c0_i32_0 : i32, i32
  }
  func.func @transform_9(%arg0: i32) -> (i32, i32) {
    %c0_i32 = arith.constant 0 : i32
    %c0_i32_0 = arith.constant 0 : i32
    %c0_i32_1 = arith.constant 0 : i32
    return %c0_i32, %c0_i32_0 : i32, i32
  }
  func.func @transform_10(%arg0: i32) -> (i32, i32, i32) {
    %c0_i32 = arith.constant 0 : i32
    %c0_i32_0 = arith.constant 0 : i32
    %c0_i32_1 = arith.constant 0 : i32
    return %arg0, %c0_i32, %c0_i32_0 : i32, i32, i32
  }
}

</mosaic_0001>

<bundles_post_ra>
// kernel: tpu_custom_call.1
= control target key start
LH: loop header
LB: loop body
LE: loop exit
PB: predicated region body
PF: predicated region fallthrough
CT: control target
= control target key end

     0   :  { %s2710_s0 = inlined_call_operand.hbm [shape: f32[2,32,256], index: 0, kind: input, shape index: {}]   ;;  %s2711_s1 = inlined_call_operand.hbm [shape: f32[9,256], index: 1, kind: input, shape index: {}]   ;;  %s2712_s2 = inlined_call_operand.vmem [shape: f32[2,32], index: 2, kind: input, shape index: {}]   ;;  %s2713_s3 = inlined_call_operand.vmem [shape: f32[2,1], index: 3, kind: input, shape index: {}]   ;;  %s2714_s4 = inlined_call_operand.vmem [shape: f32[2,18], index: 4, kind: input, shape index: {}]   ;;  %s2715_s5 = inlined_call_operand.vmem [shape: f32[2,1], index: 5, kind: input, shape index: {}]   ;;  %s2716_s6 = inlined_call_operand.vmem [shape: f32[2,18], index: 6, kind: input, shape index: {}]   ;;  %s2717_s7 = inlined_call_operand.vmem [shape: f32[2,1], index: 7, kind: input, shape index: {}]   ;;  %s2718_s8 = inlined_call_operand.vmem [shape: f32[1,2], index: 8, kind: input, shape index: {}]   ;;  %s2719_s9 = inlined_call_operand.<no memory space> [shape: f32[1,1], index: 9, kind: input, shape index: {}]   ;;  %s2720_s10 = inlined_call_operand.hbm [shape: f32[2,1,256], index: 10, kind: output, shape index: {}]  }
   0x1   :  { %2732 = sst [smem:[#allocation14_spill]] %s2711_s1  ;;  %v15_v0 = vstv %s2719_s9 }
   0x2   :  { %16 = vst [vmem:[#allocation2] sm:$0x1] %v15_v0 }
   0x3   :  { %17 = vsyncpa [#allocation4], 0 }
   0x4   :  { %19 = vsyncpa [#allocation4 + $0x1], 0 }
   0x5   :  { %20 = vsyncpa [#allocation7], 0 }
   0x6   :  { %21 = vsyncpa [#allocation5], 0 }
   0x7   :  { %23 = vsyncpa [#allocation5 + $0x1], 0  ;;  %s2066_s15 = smov 0   ;;  %s2068_s16 = smov 0  }
   0x8   :  { %s2070_s17 = smov 0   ;;  %s2072_s18 = smov 0  }
   0x9 LB: > { %2733 = sst [smem:[#allocation12_spill]] %s1976_s17  ;;  %s2087_s9 = sadd.s32 4294967295, %s1980_s18   ;;  %s1980_s18 = sphi %s2072_s18, %s2756_s18   ;;  %s1976_s17 = sphi %s2070_s17, %s2753_s17   ;;  %s1972_s16 = sphi %s2068_s16, %s2755_s16   ;;  %s1968_s15 = sphi %s2066_s15, %s2754_s15  }
   0xa   : > { %s1711_s19 = sadd.s32 4294967294, %s1980_s18   ;;  %p49_p0 = scmp.ne.s32.totalorder %s1972_s16, %s1968_s15 }
   0xb   : > { %p50_p1 = scmp.eq.s32.totalorder %s2087_s9, 0  ;;  %p262_p2 = scmp.eq.s32.totalorder %s2087_s9, 1 }
   0xc   : > { %p268_p3 = scmp.eq.s32.totalorder %s1711_s19, 1  ;;  %p1712_p5 = scmp.ge.s32.totalorder %s1980_s18, 1 }
   0xd   : > { %p2096_p4 = por %p50_p1, %p49_p0  ;;  %p275_p7 = scmp.lt.s32.totalorder %s1980_s18, 3 }
   0xe   : > { %p2101_p6 = por %p268_p3, %p49_p0  ;;  %s2736_s1 = sld [smem:[#allocation14_spill]] }
   0xf   : > { %p2109_p8 = pnand %p1712_p5, %p275_p7  ;;  %s1982_s26 = smov [#allocation6]  }
  0x10   : > { %s288_s27 = sshll.u32 %s1982_s26, 4  ;;  %s2119_s28 = sadd.s32 1, %s1980_s18   ;;  %s289_s27 = int_to_ptr.vmem [resolvable:$true] %s288_s27 }
  0x11   : > { %p1735_p9 = pneg %p2109_p8  ;;  %s2721_s29 = smov 256  }
  0x12   : > { %s2722_s30 = smov 16   ;;  %s33_s11 = ssub.s32 %s1980_s18, %s2119_s28 }
  0x13   : > { %p1736_p10 = pnand %p1735_p9, %p50_p1  ;;  %s36_s12 = sadd.s32 1, %s1976_s17 }
  0x14   : > { %s286_s24 = sshll.u32 %s2736_s1, 4  ;;  %p34_p12 = scmp.eq.s32.totalorder %s33_s11, 0  ;;  %s287_s24 = int_to_ptr.hbm [resolvable:$true] %s286_s24 }
  0x15   : > { %1738 = dma.hbm_to_vmem [thread:$0]  (!%p1736_p10), %s287_s24, 512, %s289_s27, [#allocation7], %s2721_s29, %s2721_s29, %s2722_s30  }
  0x16   : > { %p43_p13 = scmp.ne.s32.totalorder %s1976_s17, %s1972_s16  ;;  %p44_p0 = scmp.eq.s32.totalorder %s1980_s18, 0 }
  0x17   : > { %s2131_s13 = scalar_select %p34_p12, %s1976_s17, %s36_s12  }
  0x18   : > { %p2135_p3 = por %p262_p2, %p43_p13  ;;  %p1748_p5 = scmp.lt.s32.totalorder %s1980_s18, 2 }
  0x19   : > { %2738 = sst [smem:[#allocation13_spill]] %s2131_s13  ;;  %s326_s19 = sand.u32 1, %s1976_s17  }
  0x1a   : > { %s1726_s22 = sshll.u32 %s1980_s18, 6  ;;  %p45_p7 = por %p44_p0, %p43_p13 }
  0x1b   : > { %s1715_s23 = sshll.u32 %s326_s19, 6  ;;  %s335_s24 = scalar_lea.hbm %s2710_s0, %s1726_s22 }
  0x1c   : > { %s336_s27 = sshll.u32 %s335_s24, 4  ;;  %s330_s11 = scalar_lea.vmem [#allocation3], %s1715_s23  ;;  %s337_s27 = int_to_ptr.hbm [resolvable:$true] %s336_s27 }
  0x1d   : > { %s338_s29 = sshll.u32 %s330_s11, 4  ;;  %p2145_p9 = pnand %p1748_p5, %p45_p7  ;;  %s339_s29 = int_to_ptr.vmem [resolvable:$true] %s338_s29 }
  0x1e   : > { %s327_s30 = scalar_lea.sflag [#allocation4], %s326_s19  ;;  %s1880_s13 = sshra.s32 %s337_s27, 4  ;;  %s1881_s13 = int_to_ptr.hbm [resolvable:$true] %s1880_s13 }
  0x1f   : > { %s1882_s17 = scalar_lea.hbm %s1881_s13, 64  ;;  %p1884_p10 = pneg %p2145_p9 }
  0x20   : > { %p1883_p2 = scmp.ne.s32.totalorder %s1881_s13, %s1882_s17  ;;  %s1887_s23 = scalar_lea.hbm %s2710_s0, 128 }
  0x21   : > { %p1888_p0 = scmp.lt.s32.totalorder %s1881_s13, %s2710_s0  ;;  %p1889_p5 = scmp.lt.s32.totalorder %s1887_s23, %s1882_s17 }
  0x22   : > { %p1885_p12 = pnand %p1884_p10, %p1883_p2 }
  0x23   : > { %p1890_p7 = por %p1889_p5, %p1888_p0 }
  0x24   : > { %p1886_p13 = pneg %p1885_p12 }
  0x26   : > { %p1891_p11 = pnand %p1890_p7, %p1886_p13 }
  0x28   : > { %1894 = shalt.err (!%p1891_p11)
}
  0x29   : > { %s2741_s19 = smov 16   ;;  %s2742_s11 = smov 256  }
  0x2a   : > { %1742 = dma.hbm_to_vmem [thread:$0]  (!%p2145_p9), %s337_s27, 1024, %s339_s29, %s327_s30, %s2742_s11, %s2742_s11, %s2741_s19  }
  0x2b   : > { %350 = sbr.rel (%p2109_p8) target bundleno = 734 (0x2de), region = 60  ;;  %s2165_s1 = sand.u32 (!%p2109_p8), 1, %s1972_s16  }
  0x2c   : > { %s1719_s13 = sshll.u32 (!%p2109_p8), %s2165_s1, 6  ;;  %s353_s17 = scalar_lea.sflag (!%p2109_p8), [#allocation4], %s2165_s1 }
  0x2d   : > { %s356_s22 = scalar_lea.vmem (!%p2109_p8), [#allocation3], %s1719_s13 }
  0x30   : > { %1955 = dma.done.wait (%p2096_p4), %s353_s17, 1024  }
  0x31   : > { %1957 = vsyncadd (%p2096_p4), %s353_s17, 4294966272 }
  0x32   : > { %1959 = dma.done.wait (%p50_p1), [#allocation7], 512  }
  0x33   : > { %1961 = vsyncadd (%p50_p1), [#allocation7], 4294966784  ;;  %v1985_v1 = vmov 0   ;;  %vm418_vm0 = vcmask 261120   ;;  %v405_v2 = vld [vmem:[%s356_s22 + $0x30] sm:$0xff]  ;;  %v403_v3 = vld [vmem:[%s356_s22 + $0x20] sm:$0xff] }
  0x34   : > { %1809 = vset.pattern.permute.xlu0 %v1985_v1  ;;  %1810 = vset.pattern.permute.xlu2 %v1985_v1  ;;  %v401_v4 = vld [vmem:[%s356_s22 + $0x10] sm:$0xff]  ;;  %v2179_v5 = vand.u32 4294901760, %v405_v2  ;;  %v2181_v6 = vand.u32 4294901760, %v403_v3  ;;  %v399_v8 = vld [vmem:[%s356_s22] sm:$0xff]  ;;  %v406_v12 = vld [vmem:[%s356_s22 + $0x38] sm:$0xff]  ;;  %v1986_v60 = vmov 1  }
  0x35   : > { %v2183_v7 = vand.u32 4294901760, %v401_v4  ;;  %v411_v9 = vld [vmem:[%s2712_s2] sm:$0x3]  ;;  %v2188_v10 = vand.u32 4294901760, %v399_v8  ;;  %v404_v13 = vld [vmem:[%s356_s22 + $0x28] sm:$0xff]  ;;  %v2207_v22 = vand.u32 4294901760, %v406_v12  ;;  %1811 = vset.pattern.permute.xlu1 %v1986_v60 }
  0x36   : > { %v420_v11 = vsel %vm418_vm0, %v411_v9, 0  ;;  %v402_v14 = vld [vmem:[%s356_s22 + $0x18] sm:$0xff]  ;;  %v464_v15 = vsub.f32 %v405_v2, %v2179_v5  ;;  %435 = vmatpush.msra.mxu0 %v2179_v5  ;;  %v2193_v16 = vsub.f32 %v403_v3, %v2181_v6  ;;  %535 = vmatpush.msra.mxu3 %v2179_v5  ;;  %v400_v20 = vld [vmem:[%s356_s22 + $0x8] sm:$0xff]  ;;  %v2209_v23 = vand.u32 4294901760, %v404_v13  ;;  %s1996_s24 = smov 60   ;;  %s1997_s19 = smov 64  }
  0x37   : > { %v2197_v17 = vsub.f32 %v401_v4, %v2183_v7  ;;  %v2199_v18 = vand.u32 4294901760, %v420_v11  ;;  %v412_v19 = vld [vmem:[%s2713_s3] sm:$0x3]  ;;  %v2205_v21 = vsub.f32 %v399_v8, %v2188_v10  ;;  %v2211_v24 = vand.u32 4294901760, %v402_v14  ;;  %s1998_s11 = smov 68   ;;  %s1999_s13 = smov 124  }
  0x38   : > { %415 = vperm.xlu0 %1809, %v412_v19   ;;  %v2216_v25 = vld [vmem:[%s2714_s4] sm:$0x3]  ;;  %506 = vmatpush.msra.mxu2 %v464_v15  ;;  %v465_v26 = vand.u32 4294901760, %v464_v15  ;;  %v471_v28 = vand.u32 4294901760, %v2193_v16  ;;  %v2226_v30 = vsub.f32 %v406_v12, %v2207_v22  ;;  %v2230_v32 = vsub.f32 %v404_v13, %v2209_v23  ;;  %s2000_s17 = smov 4   ;;  %s1721_s12 = sshll.u32 %s2165_s1, 1 }
  0x39   : > { %437 = vmatpush.msra.mxu0 %v2181_v6  ;;  %v2220_v27 = vsub.f32 %v420_v11, %v2199_v18  ;;  %v477_v29 = vand.u32 4294901760, %v2197_v17  ;;  %537 = vmatpush.msra.mxu3 %v2181_v6  ;;  %v483_v31 = vand.u32 4294901760, %v2205_v21  ;;  %v2232_v33 = vand.u32 4294901760, %v400_v20  ;;  %v793_v59 = vld [vmem:[%s2715_s5] sm:$0x3]  ;;  %s1723_s23 = sshll.u32 %s2087_s9, 1 }
  0x3a   : > { %814 = vperm.xlu2 %1810, %v2216_v25   ;;  %509 = vmatpush.msra.mxu2 %v2193_v16  ;;  %v466_v34 = vsub.f32 %v464_v15, %v465_v26  ;;  %v472_v35 = vsub.f32 %v2193_v16, %v471_v28  ;;  %v650_v38 = vand.u32 4294901760, %v2226_v30  ;;  %v656_v39 = vand.u32 4294901760, %v2230_v32  ;;  %s1616_s9 = scalar_lea.sflag [#allocation5], %s2165_s1  ;;  %s1930_s30 = scalar_lea.hbm %s2720_s10, 4 }
  0x3b   : > { %439 = vmatpush.msra.mxu0 %v2183_v7  ;;  %v2239_v36 = vand.u32 4294901760, %v2220_v27  ;;  %v478_v37 = vsub.f32 %v2197_v17, %v477_v29  ;;  %539 = vmatpush.msra.mxu3 %v2183_v7  ;;  %v661_v40 = vsub.f32 %v402_v14, %v2211_v24  ;;  %v484_v44 = vsub.f32 %v2205_v21, %v483_v31 }
  0x3c   : > { %512 = vmatpush.msra.mxu2 %v2197_v17  ;;  %v467_v41 = vand.u32 4294901760, %v466_v34  ;;  %v473_v42 = vand.u32 4294901760, %v472_v35  ;;  %v651_v45 = vsub.f32 %v2226_v30, %v650_v38  ;;  %v657_v46 = vsub.f32 %v2230_v32, %v656_v39  ;;  %824 = vperm.xlu1 %1811, %v2216_v25  }
  0x3d   : > { %441 = vmatpush.msra.mxu0 %v2188_v10  ;;  %v445_v43 = vsub.f32 %v2220_v27, %v2239_v36  ;;  %541 = vmatpush.msra.mxu3 %v2188_v10  ;;  %v662_v47 = vand.u32 4294901760, %v661_v40  ;;  %v479_v49 = vand.u32 4294901760, %v478_v37  ;;  %v667_v50 = vsub.f32 %v400_v20, %v2232_v33 }
  0x3e   : > { %468 = vmatpush.msra.mxu1 %v467_v41  ;;  %515 = vmatpush.msra.mxu2 %v2205_v21  ;;  %v652_v51 = vand.u32 4294901760, %v651_v45  ;;  %v658_v52 = vand.u32 4294901760, %v657_v46  ;;  %v485_v54 = vand.u32 4294901760, %v484_v44  ;;  %v1987_v61 = vmov 3  }
  0x3f   : > { %564 = vmatpush.msrb.mxu0 %v465_v26  ;;  %v446_v48 = vand.u32 4294901760, %v445_v43  ;;  %518 = vmatmul.f32.vlgmr.msra.gmra.mxu2 %v2220_v27  ;;  %v663_v53 = vsub.f32 %v661_v40, %v662_v47  ;;  %v668_v55 = vand.u32 4294901760, %v667_v50  ;;  %v1988_v62 = vmov 2  }
  0x40   : > { %545 = vmatmul.f32.vlgmr.msra.gmra.mxu3 %v2239_v36  ;;  %474 = vmatpush.msra.mxu1 %v473_v42  ;;  %v1989_v63 = vmov 4   ;;  %v1990_v0 = vmov 6   ;;  %v1991_v2 = vmov 7   ;;  %v1992_v3 = vmov 5  }
  0x41   : > { %620 = vmatpush.msrb.mxu2 %v2207_v22  ;;  %447 = vmatmul.f32.vlgmr.msra.gmra.mxu0 %v446_v48  ;;  %v669_v56 = vsub.f32 %v667_v50, %v668_v55  ;;  %v664_v57 = vand.u32 4294901760, %v663_v53  ;;  %v1994_v12 = vmov 9   ;;  %v1995_v13 = vmov 8  }
  0x42   : > { %653 = vmatpush.msrb.mxu3 %v652_v51  ;;  %480 = vmatpush.msra.mxu1 %v479_v49  ;;  %v2002_v34 = vmov 13   ;;  %v2003_v35 = vmov 11   ;;  %v2005_v37 = vmov 14   ;;  %v2724_v53 = vlaneseq }
  0x43   : > { %622 = vmatpush.msrb.mxu2 %v2209_v23  ;;  %568 = vmatpush.msrb.mxu0 %v471_v28  ;;  %v670_v58 = vand.u32 4294901760, %v669_v56  ;;  %vm1301_vm6 = vcmask 15360   ;;  %vm1305_vm7 = vcmask 1041408   ;;  %vm1607_vm8 = vcmask 1040384  }
  0x44   : > { %659 = vmatpush.msrb.mxu3 %v658_v52  ;;  %486 = vmatpush.msra.mxu1 %v485_v54  ;;  %v1056_v52 = vld [vmem:[%s2717_s7] sm:$0x3]  ;;  %v2364_v54 = vand.u32 127, %v2724_v53 }
  0x45   : > { %624 = vmatpush.msrb.mxu2 %v2211_v24  ;;  %488 = vmatmul.f32.vlgmr.msra.gmra.mxu1 %v2199_v18 }
  0x46   : > { %572 = vmatpush.msrb.mxu0 %v477_v29  ;;  %595 = vmatpush.msrb.mxu1 %v2179_v5  ;;  %vm837_vm1 = vcmp.lt.s32.totalorder %v2364_v54, 64  ;;  %vm805_vm2 = vcmp.lt.s32.totalorder %v2364_v54, 68  ;;  %vm868_vm3 = vcmp.lt.s32.totalorder %v2364_v54, 60  ;;  %vm954_vm4 = vcmp.lt.s32.totalorder %v2364_v54, 124 }
  0x47   : > { %626 = vmatpush.msrb.mxu2 %v2232_v33  ;;  %665 = vmatpush.msrb.mxu3 %v664_v57  ;;  %vm899_vm5 = vcmp.lt.s32.totalorder %v2364_v54, 4 }
  0x48   : > { %632 = vmatmul.f32.vlgmr.msrb.gmra.mxu2 %v446_v48  ;;  %576 = vmatpush.msrb.mxu0 %v483_v31 }
  0x49   : > { %597 = vmatpush.msrb.mxu1 %v2181_v6  ;;  %671 = vmatpush.msrb.mxu3 %v670_v58  ;;  %v2373_v58 = vld [vmem:[#allocation6] sm:$0xff] }
  0x4a   : > { %578 = vmatmul.f32.vlgmr.msrb.gmra.mxu0 %v2199_v18  ;;  %673 = vmatmul.f32.vlgmr.msrb.gmra.mxu3 %v2199_v18 }
  0x4b   : > { %599 = vmatpush.msrb.mxu1 %v2183_v7  ;;  %691 = vmatpush.msra.mxu0 %v2226_v30  ;;  %v1993_v7 = vmov 10  }
  0x4c   : > { %749 = vmatpush.msra.mxu2 %v650_v38  ;;  %780 = vmatpush.msra.mxu3 %v2207_v22  ;;  %v2006_v38 = vmov 17  }
  0x4d   : > { %601 = vmatpush.msrb.mxu1 %v2188_v10  ;;  %694 = vmatpush.msra.mxu0 %v2230_v32 }
  0x4e   : > { %753 = vmatpush.msra.mxu2 %v656_v39  ;;  %603 = vmatmul.f32.vlgmr.msrb.gmra.mxu1 %v2199_v18  ;;  %v2730_v39 = vmov 16  }
  0x4f   : > { %796 = vperm.xlu0 %1809, %v793_v59   ;;  %697 = vmatpush.msra.mxu0 %v661_v40  ;;  %v2376_v59 = vld [vmem:[#allocation6 + $0x8] sm:$0xff] }
  0x50   : > { %720 = vmatpush.msra.mxu1 %v2207_v22  ;;  %757 = vmatpush.msra.mxu2 %v662_v47 }
  0x51   : > { %782 = vmatpush.msra.mxu3 %v2209_v23  ;;  %700 = vmatpush.msra.mxu0 %v667_v50 }
  0x52   : > { %722 = vmatpush.msra.mxu1 %v2209_v23  ;;  %761 = vmatpush.msra.mxu2 %v668_v55 }
  0x53   : > { %784 = vmatpush.msra.mxu3 %v2211_v24  ;;  %703 = vmatmul.f32.vlgmr.msra.gmra.mxu0 %v2220_v27 }
  0x54   : > { %763 = vmatmul.f32.vlgmr.msra.gmra.mxu2 %v2199_v18  ;;  %724 = vmatpush.msra.mxu1 %v2211_v24 }
  0x55   : > { %786 = vmatpush.msra.mxu3 %v2232_v33  ;;  %1813 = vset.pattern.permute.xlu2 %v1987_v61 }
  0x56   : > { %788 = vmatmul.f32.vlgmr.msra.gmra.mxu3 %v2199_v18  ;;  %726 = vmatpush.msra.mxu1 %v2232_v33  ;;  %v2001_v33 = vmov 12  }
  0x57   : > { %730 = vmatmul.f32.vlgmr.msra.gmra.mxu1 %v2239_v36  ;;  %855 = vperm.xlu2 %1813, %v2216_v25   ;;  %v2004_v36 = vmov 15  }
  0x58   : > { %1812 = vset.pattern.permute.xlu1 %v1988_v62  ;;  %1815 = vset.pattern.permute.xlu0 %v1992_v3 }
  0x59   : > { %845 = vperm.xlu1 %1812, %v2216_v25   ;;  %886 = vperm.xlu0 %1815, %v2216_v25  }
  0x5f   : > { %1814 = vset.pattern.permute.xlu2 %v1989_v63 }
  0x60   : > { %876 = vperm.xlu2 %1814, %v2216_v25  }
  0x61   : > { %1816 = vset.pattern.permute.xlu1 %v1990_v0  ;;  %1818 = vset.pattern.permute.xlu0 %v1995_v13 }
  0x62   : > { %907 = vperm.xlu1 %1816, %v2216_v25  }
  0x68   : > { %1817 = vset.pattern.permute.xlu2 %v1991_v2 }
  0x69   : > { %917 = vperm.xlu2 %1817, %v2216_v25  }
  0x6a   : > { %1819 = vset.pattern.permute.xlu1 %v1994_v12 }
  0x71   : > { %1820 = vset.pattern.permute.xlu2 %v1993_v7 }
  0x94   : > { %v815_v40 = vpop.permute.xlu2 %814 }
  0xaa   : > { %v416_v4 = vpop.permute.xlu0 %415 }
  0xae   : > { %v825_v42 = vpop.permute.xlu1 %824 }
  0xb1   : > { %v2348_v41 = vpop.permute.xlu2 %855 }
  0xba   : > { %v2350_v43 = vpop.permute.xlu2 %876 }
  0xbe   : > { %v448_v5 = vpop.f32.mrf.mxu0 }
  0xbf   : > { %v449_v6 = vadd.f32 %v448_v5, %v416_v4  ;;  %v2729_v5 = vperm.slane %v2373_v58, 0 }
  0xc1   : > { %v797_v46 = vpop.permute.xlu0 %796 }
  0xc2   : > { %v489_v8 = vpop.f32.mrf.mxu1  ;;  %v519_v9 = vpop.f32.mrf.mxu2 }
  0xc3   : > { %v490_v10 = vadd.f32 %v489_v8, %v449_v6  ;;  %v546_v11 = vpop.f32.mrf.mxu3  ;;  %v2354_v45 = vpop.permute.xlu2 %917  ;;  %v2728_v6 = vperm.slane %v2376_v59, 0 }
  0xc5   : > { %v520_v14 = vadd.f32 %v519_v9, %v490_v10 }
  0xc7   : > { %v579_v15 = vpop.f32.mrf.mxu0  ;;  %v547_v16 = vadd.f32 %v546_v11, %v520_v14 }
  0xc9   : > { %v580_v17 = vadd.f32 %v579_v15, %v547_v16 }
  0xcb   : > { %v633_v18 = vpop.f32.mrf.mxu2  ;;  %v604_v19 = vpop.f32.mrf.mxu1 }
  0xcc   : > { %v634_v20 = vadd.f32 %v633_v18, %v416_v4  ;;  %v2304_v21 = vadd.f32 %v604_v19, %v580_v17  ;;  %v2352_v44 = vpop.permute.xlu1 %845  ;;  %v2358_v48 = vpop.permute.xlu0 %886  ;;  %v2725_v4 = vperm.slane %v2376_v59, 1  ;;  %v2727_v19 = vperm.slane %v2373_v58, 2 }
  0xcd   : > { %v674_v22 = vpop.f32.mrf.mxu3 }
  0xce   : > { %864 = vrot.lane.b32.xlu2 %v2304_v21, %s1996_s24  ;;  %833 = vrot.lane.b32.xlu1 %v2304_v21, %s1997_s19  ;;  %v675_v23 = vadd.f32 %v674_v22, %v634_v20  ;;  %v2731_v20 = vperm.slane %v2376_v59, 2 }
  0xcf   : > { %799 = vrot.lane.b32.xlu0 %v2304_v21, %s1998_s11 }
  0xd0   : > { %v704_v24 = vpop.f32.mrf.mxu0 }
  0xd1   : > { %v705_v26 = vadd.f32 %v704_v24, %v675_v23 }
  0xd4   : > { %v731_v27 = vpop.f32.mrf.mxu1  ;;  %v2356_v47 = vpop.permute.xlu1 %907 }
  0xd5   : > { %v732_v28 = vadd.f32 %v731_v27, %v705_v26 }
  0xd6   : > { %950 = vrot.lane.b32.xlu1 %v2304_v21, %s1999_s13 }
  0xd7   : > { %v764_v29 = vpop.f32.mrf.mxu2  ;;  %895 = vrot.lane.b32.xlu0 %v2304_v21, %s2000_s17 }
  0xd8   : > { %v765_v30 = vadd.f32 %v764_v29, %v732_v28  ;;  %v2427_v28 = vld [vmem:[%s2716_s6] sm:$0x3] }
  0xd9   : > { %v789_v31 = vpop.f32.mrf.mxu3 }
  0xda   : > { %v2316_v32 = vadd.f32 %v789_v31, %v765_v30 }
  0xdc   : > { %835 = vrot.lane.b32.xlu2 %v2316_v32, %s1997_s19 }
  0xde   : > { %801 = vrot.lane.b32.xlu1 %v2316_v32, %s1998_s11 }
  0xdf   : > { %866 = vrot.lane.b32.xlu0 %v2316_v32, %s1996_s24 }
  0xe4   : > { %962 = vperm.xlu2 %1820, %v2216_v25  }
  0xe6   : > { %941 = vperm.xlu1 %1819, %v2216_v25  }
  0xe7   : > { %931 = vperm.xlu0 %1818, %v2216_v25  }
  0xec   : > { %1822 = vset.pattern.permute.xlu2 %v2001_v33 }
  0xed   : > { %986 = vperm.xlu2 %1822, %v2216_v25  }
  0xee   : > { %897 = vrot.lane.b32.xlu1 %v2316_v32, %s2000_s17 }
  0xef   : > { %1823 = vset.pattern.permute.xlu0 %v2002_v34  ;;  %1821 = vset.pattern.permute.xlu1 %v2003_v35 }
  0xf0   : > { %996 = vperm.xlu0 %1823, %v2216_v25  }
  0xf5   : > { %952 = vrot.lane.b32.xlu2 %v2316_v32, %s1999_s13 }
  0xf6   : > { %1825 = vset.pattern.permute.xlu2 %v2004_v36  ;;  %972 = vperm.xlu1 %1821, %v2216_v25  }
  0xf8   : > { %1830 = vset.pattern.permute.xlu0 %v1986_v60  ;;  %v2726_v60 = vperm.slane %v2373_v58, 1 }
  0xf9   : > { %1082 = vperm.xlu0 %1830, %v2427_v28  }
  0xfd   : > { %1020 = vperm.xlu2 %1825, %v2216_v25  }
  0xfe   : > { %1824 = vset.pattern.permute.xlu1 %v2005_v37 }
  0xff   : > { %1010 = vperm.xlu1 %1824, %v2216_v25  }
 0x101   : > { %1834 = vset.pattern.permute.xlu0 %v1992_v3 }
 0x102   : > { %1138 = vperm.xlu0 %1834, %v2427_v28  }
 0x105   : > { %1827 = vset.pattern.permute.xlu2 %v2006_v38 }
 0x106   : > { %1044 = vperm.xlu2 %1827, %v2216_v25  }
 0x107   : > { %1826 = vset.pattern.permute.xlu1 %v2730_v39 }
 0x108   : > { %1034 = vperm.xlu1 %1826, %v2216_v25  }
 0x10a   : > { %1837 = vset.pattern.permute.xlu0 %v1995_v13 }
 0x10e   : > { %1829 = vset.pattern.permute.xlu2 %v1985_v1 }
 0x10f   : > { %1059 = vperm.xlu2 %1829, %v1056_v52  }
 0x110   : > { %1828 = vset.pattern.permute.xlu1 %v1985_v1 }
 0x111   : > { %1072 = vperm.xlu1 %1828, %v2427_v28  }
 0x117   : > { %1832 = vset.pattern.permute.xlu2 %v1987_v61 }
 0x118   : > { %1110 = vperm.xlu2 %1832, %v2427_v28  }
 0x119   : > { %1831 = vset.pattern.permute.xlu1 %v1988_v62  ;;  %v957_v62 = vperm.slane %v2373_v58, 5 }
 0x11a   : > { %1100 = vperm.xlu1 %1831, %v2427_v28  }
 0x120   : > { %1833 = vset.pattern.permute.xlu2 %v1989_v63  ;;  %v958_v63 = vperm.slane %v2376_v59, 5 }
 0x121   : > { %1128 = vperm.xlu2 %1833, %v2427_v28  }
 0x122   : > { %1835 = vset.pattern.permute.xlu1 %v1990_v0 }
 0x123   : > { %1156 = vperm.xlu1 %1835, %v2427_v28  }
 0x128   : > { %v865_v25 = vpop.permute.xlu2 %864 }
 0x129   : > { %1836 = vset.pattern.permute.xlu2 %v1991_v2 }
 0x12a   : > { %1166 = vperm.xlu2 %1836, %v2427_v28  }
 0x12b   : > { %1838 = vset.pattern.permute.xlu1 %v1994_v12 }
 0x132   : > { %1839 = vset.pattern.permute.xlu2 %v1993_v7 }
 0x136   : > { %v836_v49 = vpop.permute.xlu2 %835 }
 0x13e   : > { %v2370_v57 = vpop.permute.xlu2 %962 }
 0x140   : > { %v834_v50 = vpop.permute.xlu1 %833 }
 0x141   : > { %v800_v51 = vpop.permute.xlu0 %799  ;;  %v2385_v8 = vsel %vm837_vm1, %v834_v50, %v836_v49  ;;  %v2389_v61 = vsel %vm837_vm1, %v836_v49, %v834_v50 }
 0x142   : > { %v842_v15 = vmul.f32 %v2726_v60, %v2389_v61  ;;  %v843_v16 = vmul.f32 %v2725_v4, %v2385_v8 }
 0x144   : > { %v848_v31 = vperm.slane %v842_v15, 0  ;;  %v849_v49 = vperm.slane %v843_v16, 0  ;;  %v858_v52 = vperm.slane %v842_v15, 1 }
 0x147   : > { %v2414_v22 = vpop.permute.xlu2 %986 }
 0x148   : > { %v2366_v55 = vpop.permute.xlu1 %950 }
 0x149   : > { %v2368_v56 = vpop.permute.xlu0 %895 }
 0x150   : > { %v802_v9 = vpop.permute.xlu1 %801 }
 0x151   : > { %v2393_v10 = vsel %vm805_vm2, %v800_v51, %v802_v9  ;;  %v2397_v11 = vsel %vm805_vm2, %v802_v9, %v800_v51  ;;  %v867_v14 = vpop.permute.xlu0 %866 }
 0x152   : > { %v810_v17 = vmul.f32 %v2729_v5, %v2397_v11  ;;  %v811_v18 = vmul.f32 %v2728_v6, %v2393_v10  ;;  %v2418_v26 = vsel %vm868_vm3, %v865_v25, %v867_v14  ;;  %v2422_v27 = vsel %vm868_vm3, %v867_v14, %v865_v25 }
 0x153   : > { %v859_v25 = vperm.slane %v843_v16, 1  ;;  %v873_v9 = vmul.f32 %v2727_v19, %v2422_v27  ;;  %v874_v14 = vmul.f32 %v2731_v20, %v2418_v26 }
 0x154   : > { %v817_v23 = vperm.slane %v810_v17, 0  ;;  %v818_v24 = vperm.slane %v811_v18, 0  ;;  %v827_v29 = vperm.slane %v810_v17, 1  ;;  %v828_v30 = vperm.slane %v811_v18, 1 }
 0x155   : > { %v861_v19 = vmul.f32 %v859_v25, %v2348_v41  ;;  %v879_v39 = vperm.slane %v873_v9, 0  ;;  %v880_v20 = vperm.slane %v874_v14, 0 }
 0x156   : > { %v819_v50 = vmul.f32 %v817_v23, %v815_v40  ;;  %v820_v51 = vmul.f32 %v818_v24, %v815_v40  ;;  %v829_v53 = vmul.f32 %v827_v29, %v825_v42  ;;  %v830_v4 = vmul.f32 %v828_v30, %v825_v42  ;;  %v953_v42 = vpop.permute.xlu2 %952 }
 0x157   : > { %v850_v40 = vmul.f32 %v848_v31, %v2352_v44  ;;  %v851_v23 = vmul.f32 %v849_v49, %v2352_v44  ;;  %v860_v24 = vmul.f32 %v858_v52, %v2348_v41  ;;  %v889_v41 = vperm.slane %v873_v9, 1 }
 0x158   : > { %v821_v17 = vadd.f32 %v819_v50, %v797_v46  ;;  %v822_v18 = vadd.f32 %v820_v51, %v797_v46  ;;  %v2438_v60 = vpop.permute.xlu1 %941  ;;  %v890_v29 = vperm.slane %v874_v14, 1  ;;  %v926_v30 = vperm.slane %v2373_v58, 4 }
 0x159   : > { %v927_v31 = vperm.slane %v2376_v59, 4  ;;  %v955_v49 = vsel %vm954_vm4, %v2366_v55, %v953_v42  ;;  %v956_v50 = vsel %vm954_vm4, %v953_v42, %v2366_v55  ;;  %v891_v25 = vmul.f32 %v889_v41, %v2358_v48  ;;  %v932_v41 = vpop.permute.xlu0 %931 }
 0x15a   : > { %v831_v15 = vadd.f32 %v829_v53, %v821_v17  ;;  %v832_v16 = vadd.f32 %v830_v4, %v822_v18  ;;  %v902_v53 = vperm.slane %v2373_v58, 3  ;;  %v903_v4 = vperm.slane %v2376_v59, 3 }
 0x15b   : > { %v892_v55 = vmul.f32 %v890_v29, %v2358_v48  ;;  %v929_v9 = vmul.f32 %v927_v31, %v2316_v32  ;;  %v981_v48 = vperm.slane %v2373_v58, 6 }
 0x15c   : > { %v852_v6 = vadd.f32 %v850_v40, %v831_v15  ;;  %v853_v5 = vadd.f32 %v851_v23, %v832_v16  ;;  %v959_v23 = vmul.f32 %v957_v62, %v955_v49  ;;  %v960_v15 = vmul.f32 %v958_v63, %v956_v50 }
 0x15d   : > { %v982_v16 = vperm.slane %v2376_v59, 6 }
 0x15e   : > { %v862_v44 = vadd.f32 %v860_v24, %v852_v6  ;;  %v863_v46 = vadd.f32 %v861_v19, %v853_v5  ;;  %v881_v5 = vmul.f32 %v879_v39, %v2350_v43  ;;  %v882_v6 = vmul.f32 %v880_v20, %v2350_v43 }
 0x15f   : > { %v965_v2 = vperm.slane %v959_v23, 0  ;;  %v984_v0 = vmul.f32 %v982_v16, %v2397_v11 }
 0x160   : > { %v898_v19 = vpop.permute.xlu1 %897  ;;  %v883_v43 = vadd.f32 %v881_v5, %v862_v44  ;;  %v884_v20 = vadd.f32 %v882_v6, %v863_v46  ;;  %v945_v44 = vperm.slane %v929_v9, 1  ;;  %v935_v6 = vperm.slane %v929_v9, 0 }
 0x161   : > { %v900_v3 = vsel %vm899_vm5, %v2368_v56, %v898_v19  ;;  %v901_v39 = vsel %vm899_vm5, %v898_v19, %v2368_v56  ;;  %v928_v56 = vmul.f32 %v926_v30, %v2304_v21  ;;  %v990_v11 = vperm.slane %v984_v0, 0 }
 0x162   : > { %v904_v51 = vmul.f32 %v902_v53, %v901_v39  ;;  %v905_v52 = vmul.f32 %v903_v4, %v900_v3  ;;  %v893_v24 = vadd.f32 %v891_v25, %v883_v43  ;;  %v894_v32 = vadd.f32 %v892_v55, %v884_v20 }
 0x163   : > { %v944_v46 = vperm.slane %v928_v56, 1  ;;  %v934_v29 = vperm.slane %v928_v56, 0  ;;  %v983_v39 = vmul.f32 %v981_v48, %v2393_v10  ;;  %v937_v20 = vmul.f32 %v935_v6, %v932_v41 }
 0x164   : > { %v910_v14 = vperm.slane %v904_v51, 0  ;;  %v911_v17 = vperm.slane %v905_v52, 0  ;;  %v920_v18 = vperm.slane %v904_v51, 1  ;;  %v921_v40 = vperm.slane %v905_v52, 1 }
 0x165   : > { %v936_v43 = vmul.f32 %v934_v29, %v932_v41  ;;  %v1006_v25 = vperm.slane %v2376_v59, 7  ;;  %v946_v13 = vmul.f32 %v944_v46, %v2438_v60  ;;  %v947_v55 = vmul.f32 %v945_v44, %v2438_v60  ;;  %v2521_v29 = vld [vmem:[#allocation6 + $0x10] ss:$0 sm:$0xff] }
 0x166   : > { %v912_v42 = vmul.f32 %v910_v14, %v2356_v47  ;;  %v913_v21 = vmul.f32 %v911_v17, %v2356_v47  ;;  %v922_v5 = vmul.f32 %v920_v18, %v2354_v45  ;;  %v923_v50 = vmul.f32 %v921_v40, %v2354_v45 }
 0x167   : > { %v966_v47 = vperm.slane %v960_v15, 0  ;;  %v1005_v45 = vperm.slane %v2373_v58, 7  ;;  %v967_v10 = vmul.f32 %v965_v2, %v2370_v57  ;;  %v989_v17 = vperm.slane %v983_v39, 0 }
 0x168   : > { %v914_v19 = vadd.f32 %v912_v42, %v893_v24  ;;  %v915_v49 = vadd.f32 %v913_v21, %v894_v32  ;;  %v973_v3 = vpop.permute.xlu1 %972  ;;  %v975_v18 = vperm.slane %v959_v23, 1  ;;  %v976_v40 = vperm.slane %v960_v15, 1  ;;  %v1021_v21 = vpop.permute.xlu2 %1020 }
 0x169   : > { %v968_v14 = vmul.f32 %v966_v47, %v2370_v57  ;;  %v1007_v42 = vmul.f32 %v1005_v45, %v2385_v8  ;;  %v1008_v60 = vmul.f32 %v1006_v25, %v2389_v61  ;;  %v991_v23 = vmul.f32 %v989_v17, %v2414_v22  ;;  %v2523_v8 = vld [vmem:[#allocation6 + $0x18] ss:$0 sm:$0xff] }
 0x16a   : > { %v924_v51 = vadd.f32 %v922_v5, %v914_v19  ;;  %v925_v52 = vadd.f32 %v923_v50, %v915_v49  ;;  %v977_v57 = vmul.f32 %v975_v18, %v973_v3  ;;  %v978_v41 = vmul.f32 %v976_v40, %v973_v3  ;;  %v997_v5 = vpop.permute.xlu0 %996 }
 0x16b   : > { %v992_v15 = vmul.f32 %v990_v11, %v2414_v22  ;;  %v999_v61 = vperm.slane %v983_v39, 1  ;;  %v1000_v19 = vperm.slane %v984_v0, 1  ;;  %v1013_v50 = vperm.slane %v1007_v42, 0 }
 0x16c   : > { %v938_v9 = vadd.f32 %v936_v43, %v924_v51  ;;  %v939_v56 = vadd.f32 %v937_v20, %v925_v52  ;;  %v1014_v2 = vperm.slane %v1008_v60, 0  ;;  %v1031_v20 = vmul.f32 %v2521_v29, %v2418_v26 }
 0x16d   : > { %v1001_v47 = vmul.f32 %v999_v61, %v997_v5  ;;  %v1002_v3 = vmul.f32 %v1000_v19, %v997_v5  ;;  %v1032_v22 = vmul.f32 %v2523_v8, %v2422_v27  ;;  %v1023_v51 = vperm.slane %v1007_v42, 1 }
 0x16e   : > { %v948_v24 = vadd.f32 %v946_v13, %v938_v9  ;;  %v949_v32 = vadd.f32 %v947_v55, %v939_v56  ;;  %v1024_v52 = vperm.slane %v1008_v60, 1  ;;  %v1037_v17 = vperm.slane %v1031_v20, 0 }
 0x16f   : > { %v1025_v9 = vmul.f32 %v1023_v51, %v1021_v21  ;;  %v1038_v11 = vperm.slane %v1032_v22, 0  ;;  %v1047_v26 = vperm.slane %v1031_v20, 1 }
 0x170   : > { %v969_v44 = vadd.f32 %v967_v10, %v948_v24  ;;  %v970_v46 = vadd.f32 %v968_v14, %v949_v32  ;;  %v1026_v56 = vmul.f32 %v1024_v52, %v1021_v21  ;;  %v1045_v18 = vpop.permute.xlu2 %1044 }
 0x171   : > { %v1011_v6 = vpop.permute.xlu1 %1010  ;;  %v1049_v42 = vmul.f32 %v1047_v26, %v1045_v18 }
 0x172   : > { %v979_v7 = vadd.f32 %v977_v57, %v969_v44  ;;  %v980_v49 = vadd.f32 %v978_v41, %v970_v46  ;;  %v1015_v39 = vmul.f32 %v1013_v50, %v1011_v6  ;;  %v1016_v0 = vmul.f32 %v1014_v2, %v1011_v6  ;;  %v1083_v19 = vpop.permute.xlu0 %1082 }
 0x173   : > { %v1048_v44 = vperm.slane %v1032_v22, 1 }
 0x174   : > { %v993_v43 = vadd.f32 %v991_v23, %v979_v7  ;;  %v994_v12 = vadd.f32 %v992_v15, %v980_v49 }
 0x175   : > { %v1050_v60 = vmul.f32 %v1048_v44, %v1045_v18 }
 0x176   : > { %v1003_v13 = vadd.f32 %v1001_v47, %v993_v43  ;;  %v1004_v55 = vadd.f32 %v1002_v3, %v994_v12  ;;  %v2744_v47 = vperm.slane %v2373_v58, 0  ;;  %v2745_v43 = vperm.slane %v2376_v59, 0 }
 0x178   : > { %v1017_v10 = vadd.f32 %v1015_v39, %v1003_v13  ;;  %v1018_v14 = vadd.f32 %v1016_v0, %v1004_v55 }
 0x17a   : > { %v1035_v40 = vpop.permute.xlu1 %1034  ;;  %v1027_v24 = vadd.f32 %v1025_v9, %v1017_v10  ;;  %v1028_v32 = vadd.f32 %v1026_v56, %v1018_v14 }
 0x17b   : > { %v1039_v46 = vmul.f32 %v1037_v17, %v1035_v40  ;;  %v1040_v27 = vmul.f32 %v1038_v11, %v1035_v40  ;;  %v2746_v40 = vperm.slane %v2373_v58, 1 }
 0x17d   : > { %v1041_v57 = vadd.f32 %v1039_v46, %v1027_v24  ;;  %v1042_v41 = vadd.f32 %v1040_v27, %v1028_v32  ;;  %v2747_v32 = vperm.slane %v2376_v59, 1  ;;  %v2748_v27 = vperm.slane %v2373_v58, 2 }
 0x17f   : > { %v1051_v23 = vadd.f32 %v1049_v42, %v1041_v57  ;;  %v1052_v15 = vadd.f32 %v1050_v60, %v1042_v41  ;;  %v2749_v60 = vperm.slane %v2376_v59, 2 }
 0x181   : > { %v2529_v5 = vmax.f32 %v1051_v23, 0.0  ;;  %v2531_v21 = vmax.f32 %v1052_v15, 0.0 }
 0x183   : > { %1064 = vrot.lane.b32.xlu1 %v2531_v21, %s1998_s11  ;;  %1091 = vrot.lane.b32.xlu2 %v2529_v5, %s1997_s19  ;;  %v1073_v6 = vpop.permute.xlu1 %1072 }
 0x184   : > { %1062 = vrot.lane.b32.xlu0 %v2529_v5, %s1998_s11  ;;  %s398_s11 = scalar_lea.vmem [#allocation8], %s1721_s12 }
 0x18b   : > { %1119 = vrot.lane.b32.xlu1 %v2529_v5, %s1996_s24  ;;  %1121 = vrot.lane.b32.xlu2 %v2531_v21, %s1996_s24 }
 0x18c   : > { %1093 = vrot.lane.b32.xlu0 %v2531_v21, %s1997_s19  ;;  %v1101_v61 = vpop.permute.xlu1 %1100  ;;  %s1626_s19 = scalar_lea.hbm %s2720_s10, %s1723_s23 }
 0x193   : > { %1188 = vperm.xlu1 %1838, %v2427_v28   ;;  %1206 = vperm.xlu2 %1839, %v2427_v28  }
 0x194   : > { %1147 = vrot.lane.b32.xlu0 %v2529_v5, %s2000_s17 }
 0x19b   : > { %1149 = vrot.lane.b32.xlu1 %v2531_v21, %s2000_s17  ;;  %1199 = vrot.lane.b32.xlu2 %v2531_v21, %s1999_s13  ;;  %s1630_s17 = sshll.u32 %s1626_s19, 4  ;;  %s1631_s17 = int_to_ptr.hbm [resolvable:$true] %s1630_s17 }
 0x19c   : > { %1178 = vperm.xlu0 %1837, %v2427_v28   ;;  %1841 = vset.pattern.permute.xlu2 %v2001_v33  ;;  %v2743_v33 = vmov 16   ;;  %s1924_s22 = sshra.s32 %s1631_s17, 4  ;;  %s1925_s22 = int_to_ptr.hbm [resolvable:$true] %s1924_s22 }
 0x19d   : > { %1840 = vset.pattern.permute.xlu1 %v2003_v35  ;;  %s1926_s20 = scalar_lea.hbm %s1925_s22, 2  ;;  %p1931_p11 = scmp.lt.s32.totalorder %s1925_s22, %s2720_s10 }
 0x19e   : > { %p1927_p1 = scmp.ne.s32.totalorder %s1925_s22, %s1926_s20  ;;  %p1932_p9 = scmp.lt.s32.totalorder %s1930_s30, %s1926_s20 }
 0x1a0   : > { %p1928_p4 = pnand %p1927_p1, %p2135_p3  ;;  %p1933_p2 = por %p1932_p9, %p1931_p11 }
 0x1a2   : > { %p1929_p8 = pneg %p1928_p4 }
 0x1a3   : > { %1197 = vrot.lane.b32.xlu1 %v2529_v5, %s1999_s13  ;;  %1228 = vperm.xlu2 %1841, %v2427_v28   ;;  %s1628_s13 = sshll.u32 %s398_s11, 4  ;;  %s1629_s13 = int_to_ptr.vmem [resolvable:$true] %s1628_s13 }
 0x1a4   : > { %1842 = vset.pattern.permute.xlu0 %v2002_v34  ;;  %v1060_v34 = vpop.permute.xlu2 %1059  ;;  %p1934_p10 = pnand %p1933_p2, %p1929_p8 }
 0x1a5   : > { %1238 = vperm.xlu0 %1842, %v2427_v28  }
 0x1ab   : > { %1216 = vperm.xlu1 %1840, %v2427_v28   ;;  %1844 = vset.pattern.permute.xlu2 %v2004_v36 }
 0x1ac   : > { %1260 = vperm.xlu2 %1844, %v2427_v28   ;;  %v1111_v35 = vpop.permute.xlu2 %1110 }
 0x1ad   : > { %1847 = vset.pattern.permute.xlu0 %v1985_v1  ;;  %v2573_v1 = vpop.permute.xlu1 %1156 }
 0x1b3   : > { %1843 = vset.pattern.permute.xlu1 %v2005_v37  ;;  %v1139_v37 = vpop.permute.xlu0 %1138 }
 0x1b4   : > { %1250 = vperm.xlu1 %1843, %v2427_v28   ;;  %1846 = vset.pattern.permute.xlu2 %v2006_v38  ;;  %v1129_v36 = vpop.permute.xlu2 %1128 }
 0x1b5   : > { %1282 = vperm.xlu2 %1846, %v2427_v28  }
 0x1bc   : > { %1845 = vset.pattern.permute.xlu1 %v2743_v33  ;;  %v2571_v7 = vpop.permute.xlu2 %1166 }
 0x1bd   : > { %1272 = vperm.xlu1 %1845, %v2427_v28  }
 0x1dd   : > { %v1092_v49 = vpop.permute.xlu2 %1091 }
 0x1e5   : > { %v1122_v51 = vpop.permute.xlu2 %1121 }
 0x1f5   : > { %v1065_v50 = vpop.permute.xlu1 %1064 }
 0x1f6   : > { %v1063_v38 = vpop.permute.xlu0 %1062 }
 0x1f7   : > { %v2577_v2 = vsel %vm805_vm2, %v1063_v38, %v1065_v50  ;;  %v2581_v28 = vsel %vm805_vm2, %v1065_v50, %v1063_v38 }
 0x1f8   : > { %v1068_v3 = vmul.f32 %v2581_v28, %v2744_v47  ;;  %v1069_v12 = vmul.f32 %v2577_v2, %v2745_v43 }
 0x1fa   : > { %v1075_v20 = vperm.slane %v1068_v3, 0  ;;  %v1076_v22 = vperm.slane %v1069_v12, 0  ;;  %v1085_v0 = vperm.slane %v1068_v3, 1  ;;  %v1086_v9 = vperm.slane %v1069_v12, 1 }
 0x1fc   : > { %v1077_v55 = vmul.f32 %v1075_v20, %v1073_v6  ;;  %v1078_v39 = vmul.f32 %v1076_v22, %v1073_v6  ;;  %v1087_v44 = vmul.f32 %v1085_v0, %v1083_v19  ;;  %v1088_v46 = vmul.f32 %v1086_v9, %v1083_v19  ;;  %v2617_v6 = vpop.permute.xlu2 %1206 }
 0x1fd   : > { %v1120_v52 = vpop.permute.xlu1 %1119 }
 0x1fe   : > { %v1094_v13 = vpop.permute.xlu0 %1093  ;;  %v2591_v56 = vsel %vm868_vm3, %v1120_v52, %v1122_v51  ;;  %v2595_v10 = vsel %vm868_vm3, %v1122_v51, %v1120_v52  ;;  %v1079_v11 = vadd.f32 %v1077_v55, %v1060_v34  ;;  %v1080_v18 = vadd.f32 %v1078_v39, %v1060_v34 }
 0x1ff   : > { %v2599_v14 = vsel %vm837_vm1, %v1092_v49, %v1094_v13  ;;  %v2603_v17 = vsel %vm837_vm1, %v1094_v13, %v1092_v49  ;;  %v1125_v42 = vmul.f32 %v2595_v10, %v2748_v27  ;;  %v1126_v57 = vmul.f32 %v2591_v56, %v2749_v60 }
 0x200   : > { %v1097_v24 = vmul.f32 %v2603_v17, %v2746_v40  ;;  %v1098_v26 = vmul.f32 %v2599_v14, %v2747_v32  ;;  %v1089_v49 = vadd.f32 %v1087_v44, %v1079_v11  ;;  %v1090_v50 = vadd.f32 %v1088_v46, %v1080_v18 }
 0x201   : > { %v1131_v19 = vperm.slane %v1125_v42, 0  ;;  %v1132_v3 = vperm.slane %v1126_v57, 0  ;;  %v1141_v52 = vperm.slane %v1125_v42, 1  ;;  %v1142_v13 = vperm.slane %v1126_v57, 1 }
 0x202   : > { %v1103_v23 = vperm.slane %v1097_v24, 0  ;;  %v1104_v15 = vperm.slane %v1098_v26, 0  ;;  %v1113_v33 = vperm.slane %v1097_v24, 1  ;;  %v1114_v34 = vperm.slane %v1098_v26, 1 }
 0x203   : > { %v1133_v0 = vmul.f32 %v1131_v19, %v1129_v36  ;;  %v1134_v9 = vmul.f32 %v1132_v3, %v1129_v36  ;;  %v1143_v26 = vmul.f32 %v1141_v52, %v1139_v37  ;;  %v1144_v44 = vmul.f32 %v1142_v13, %v1139_v37 }
 0x204   : > { %v1105_v38 = vmul.f32 %v1103_v23, %v1101_v61  ;;  %v1106_v47 = vmul.f32 %v1104_v15, %v1101_v61  ;;  %v1115_v22 = vmul.f32 %v1113_v33, %v1111_v35  ;;  %v1116_v51 = vmul.f32 %v1114_v34, %v1111_v35  ;;  %v1200_v27 = vpop.permute.xlu2 %1199 }
 0x205   : > { %v1189_v41 = vpop.permute.xlu1 %1188  ;;  %v1176_v36 = vmul.f32 %v2531_v21, %v927_v31  ;;  %v1175_v46 = vmul.f32 %v2529_v5, %v926_v30 }
 0x206   : > { %v1148_v43 = vpop.permute.xlu0 %1147  ;;  %v1107_v12 = vadd.f32 %v1105_v38, %v1089_v49  ;;  %v1108_v20 = vadd.f32 %v1106_v47, %v1090_v50 }
 0x207   : > { %v1192_v34 = vperm.slane %v1176_v36, 1  ;;  %v1191_v49 = vperm.slane %v1175_v46, 1  ;;  %v1182_v50 = vperm.slane %v1176_v36, 0  ;;  %v1181_v31 = vperm.slane %v1175_v46, 0 }
 0x208   : > { %v1117_v55 = vadd.f32 %v1115_v22, %v1107_v12  ;;  %v1118_v39 = vadd.f32 %v1116_v51, %v1108_v20 }
 0x209   : > { %v1194_v52 = vmul.f32 %v1192_v34, %v1189_v41 }
 0x20a   : > { %v1135_v18 = vadd.f32 %v1133_v0, %v1117_v55  ;;  %v1136_v24 = vadd.f32 %v1134_v9, %v1118_v39 }
 0x20c   : > { %v1146_v33 = vadd.f32 %v1144_v44, %v1136_v24  ;;  %v1229_v9 = vpop.permute.xlu2 %1228 }
 0x20d   : > { %v1150_v40 = vpop.permute.xlu1 %1149 }
 0x20e   : > { %v1151_v11 = vsel %vm899_vm5, %v1148_v43, %v1150_v40  ;;  %v1152_v61 = vsel %vm899_vm5, %v1150_v40, %v1148_v43  ;;  %v1179_v37 = vpop.permute.xlu0 %1178 }
 0x20f   : > { %v1153_v32 = vmul.f32 %v1152_v61, %v902_v53  ;;  %v1154_v35 = vmul.f32 %v1151_v11, %v903_v4  ;;  %v1145_v4 = vadd.f32 %v1143_v26, %v1135_v18  ;;  %v1183_v19 = vmul.f32 %v1181_v31, %v1179_v37 }
 0x210   : > { %v1184_v3 = vmul.f32 %v1182_v50, %v1179_v37  ;;  %v1270_v50 = vmul.f32 %v2523_v8, %v2595_v10 }
 0x211   : > { %v1159_v42 = vperm.slane %v1153_v32, 0  ;;  %v1160_v60 = vperm.slane %v1154_v35, 0  ;;  %v1169_v57 = vperm.slane %v1153_v32, 1  ;;  %v1170_v23 = vperm.slane %v1154_v35, 1 }
 0x213   : > { %v1161_v53 = vmul.f32 %v1159_v42, %v2573_v1  ;;  %v1162_v15 = vmul.f32 %v1160_v60, %v2573_v1  ;;  %v1171_v21 = vmul.f32 %v1169_v57, %v2571_v7  ;;  %v1172_v30 = vmul.f32 %v1170_v23, %v2571_v7 }
 0x214   : > { %v1193_v7 = vmul.f32 %v1191_v49, %v1189_v41  ;;  %v1261_v57 = vpop.permute.xlu2 %1260 }
 0x215   : > { %v1163_v5 = vadd.f32 %v1161_v53, %v1145_v4  ;;  %v1164_v38 = vadd.f32 %v1162_v15, %v1146_v33  ;;  %v1198_v47 = vpop.permute.xlu1 %1197 }
 0x216   : > { %v1201_v43 = vsel %vm954_vm4, %v1198_v47, %v1200_v27  ;;  %v1202_v1 = vsel %vm954_vm4, %v1200_v27, %v1198_v47 }
 0x217   : > { %v1173_v12 = vadd.f32 %v1171_v21, %v1163_v5  ;;  %v1174_v20 = vadd.f32 %v1172_v30, %v1164_v38  ;;  %v1203_v22 = vmul.f32 %v1201_v43, %v957_v62  ;;  %v1204_v51 = vmul.f32 %v1202_v1, %v958_v63  ;;  %v1239_v15 = vpop.permute.xlu0 %1238 }
 0x218   : > { %v1225_v62 = vmul.f32 %v2577_v2, %v981_v48  ;;  %v1226_v63 = vmul.f32 %v2581_v28, %v982_v16  ;;  %v1247_v48 = vmul.f32 %v2599_v14, %v1005_v45  ;;  %v1248_v16 = vmul.f32 %v2603_v17, %v1006_v25 }
 0x219   : > { %v1185_v13 = vadd.f32 %v1183_v19, %v1173_v12  ;;  %v1186_v55 = vadd.f32 %v1184_v3, %v1174_v20  ;;  %v1209_v39 = vperm.slane %v1203_v22, 0  ;;  %v1210_v0 = vperm.slane %v1204_v51, 0 }
 0x21a   : > { %v1219_v18 = vperm.slane %v1203_v22, 1  ;;  %v1220_v24 = vperm.slane %v1204_v51, 1  ;;  %v1231_v36 = vperm.slane %v1225_v62, 0  ;;  %v1232_v46 = vperm.slane %v1226_v63, 0 }
 0x21b   : > { %v1195_v40 = vadd.f32 %v1193_v7, %v1185_v13  ;;  %v1196_v11 = vadd.f32 %v1194_v52, %v1186_v55  ;;  %v1211_v54 = vmul.f32 %v1209_v39, %v2617_v6  ;;  %v1212_v61 = vmul.f32 %v1210_v0, %v2617_v6  ;;  %v1293_v6 = vld [vmem:[%s2718_s8] sm:$0x1] }
 0x21c   : > { %v1233_v27 = vmul.f32 %v1231_v36, %v1229_v9  ;;  %v1234_v42 = vmul.f32 %v1232_v46, %v1229_v9  ;;  %v1303_v60 = vsel %vm1301_vm6, %v1293_v6, 0  ;;  %v1241_v23 = vperm.slane %v1225_v62, 1  ;;  %v1283_v51 = vpop.permute.xlu2 %1282 }
 0x21d   : > { %v1217_v41 = vpop.permute.xlu1 %1216  ;;  %v1213_v32 = vadd.f32 %v1211_v54, %v1195_v40  ;;  %v1214_v35 = vadd.f32 %v1212_v61, %v1196_v11  ;;  %v1242_v53 = vperm.slane %v1226_v63, 1  ;;  %v1253_v34 = vperm.slane %v1247_v48, 0 }
 0x21e   : > { %v1221_v26 = vmul.f32 %v1219_v18, %v1217_v41  ;;  %v1222_v44 = vmul.f32 %v1220_v24, %v1217_v41  ;;  %v1254_v58 = vperm.slane %v1248_v16, 0  ;;  %v2662_v49 = vand.u32 4294901760, %v1303_v60 }
 0x21f   : > { %v1243_v45 = vmul.f32 %v1241_v23, %v1239_v15  ;;  %v1244_v59 = vmul.f32 %v1242_v53, %v1239_v15  ;;  %v1269_v17 = vmul.f32 %v2521_v29, %v2591_v56  ;;  %v1263_v5 = vperm.slane %v1247_v48, 1  ;;  %v1294_v56 = vld [vmem:[#allocation2] sm:$0x1] }
 0x220   : > { %v1223_v2 = vadd.f32 %v1221_v26, %v1213_v32  ;;  %v1224_v28 = vadd.f32 %v1222_v44, %v1214_v35  ;;  %v1330_v30 = vsub.f32 %v1303_v60, %v2662_v49  ;;  %v1264_v38 = vperm.slane %v1248_v16, 1  ;;  %1297 = vperm.xlu0 %1847, %v1294_v56  }
 0x221   : > { %v1265_v3 = vmul.f32 %v1263_v5, %v1261_v57  ;;  %v1275_v1 = vperm.slane %v1269_v17, 0  ;;  %v1276_v12 = vperm.slane %v1270_v50, 0  ;;  %v1285_v20 = vperm.slane %v1269_v17, 1 }
 0x222   : > { %v1235_v4 = vadd.f32 %v1233_v27, %v1223_v2  ;;  %v1236_v33 = vadd.f32 %v1234_v42, %v1224_v28  ;;  %v1266_v43 = vmul.f32 %v1264_v38, %v1261_v57  ;;  %v1286_v22 = vperm.slane %v1270_v50, 1 }
 0x223   : > { %v1331_v29 = vand.u32 4294901760, %v1330_v30  ;;  %v1287_v55 = vmul.f32 %v1285_v20, %v1283_v51 }
 0x224   : > { %v1245_v31 = vadd.f32 %v1243_v45, %v1235_v4  ;;  %v1246_v21 = vadd.f32 %v1244_v59, %v1236_v33  ;;  %v1288_v39 = vmul.f32 %v1286_v22, %v1283_v51 }
 0x225   : > { %v1332_v54 = vsub.f32 %v1330_v30, %v1331_v29 }
 0x226   : > { %v1251_v37 = vpop.permute.xlu1 %1250 }
 0x227   : > { %v1255_v14 = vmul.f32 %v1253_v34, %v1251_v37  ;;  %v1256_v25 = vmul.f32 %v1254_v58, %v1251_v37  ;;  %v1333_v63 = vand.u32 4294901760, %v1332_v54 }
 0x229   : > { %v1257_v47 = vadd.f32 %v1255_v14, %v1245_v31  ;;  %v1258_v19 = vadd.f32 %v1256_v25, %v1246_v21 }
 0x22b   : > { %v1267_v52 = vadd.f32 %v1265_v3, %v1257_v47  ;;  %v1268_v8 = vadd.f32 %v1266_v43, %v1258_v19  ;;  %v2750_v19 = vlaneseq }
 0x22d   : > { %vm1612_vm9 = vcmp.lt.s32.totalorder %v2750_v19, 256 }
 0x22f   : > { %v1273_v7 = vpop.permute.xlu1 %1272 }
 0x230   : > { %v1277_v10 = vmul.f32 %v1275_v1, %v1273_v7  ;;  %v1278_v13 = vmul.f32 %v1276_v12, %v1273_v7 }
 0x232   : > { %v1279_v0 = vadd.f32 %v1277_v10, %v1267_v52  ;;  %v1280_v9 = vadd.f32 %v1278_v13, %v1268_v8 }
 0x234   : > { %v1289_v40 = vadd.f32 %v1287_v55, %v1279_v0  ;;  %v1290_v11 = vadd.f32 %v1288_v39, %v1280_v9 }
 0x236   : > { %v1291_v61 = vmax.f32 %v1289_v40, 0.0  ;;  %v1292_v18 = vmax.f32 %v1290_v11, 0.0 }
 0x238   : > { %v1307_v24 = vsel %vm1305_vm7, %v1291_v61, 0  ;;  %v1310_v62 = vsel %vm1305_vm7, %v1292_v18, 0 }
 0x239   : > { %v1327_v41 = vand.u32 4294901760, %v1307_v24  ;;  %v1473_v32 = vand.u32 4294901760, %v1310_v62 }
 0x23b   : > { %1328 = vmatpush.msrb.mxu0 %v1327_v41  ;;  %1404 = vmatpush.msrb.mxu3 %v1327_v41  ;;  %v1354_v35 = vsub.f32 %v1307_v24, %v1327_v41  ;;  %v1500_v26 = vsub.f32 %v1310_v62, %v1473_v32 }
 0x23c   : > { %1334 = vmatmul.f32.vlgmr.msrb.gmra.mxu0 %v1333_v63  ;;  %1408 = vmatmul.f32.vlgmr.msrb.gmra.mxu3 %v1331_v29 }
 0x23d   : > { %1381 = vmatpush.msrb.mxu2 %v1354_v35  ;;  %v1355_v44 = vand.u32 4294901760, %v1354_v35  ;;  %v1501_v36 = vand.u32 4294901760, %v1500_v26 }
 0x23e   : > { %1384 = vmatmul.f32.vlgmr.msrb.gmra.mxu2 %v1330_v30 }
 0x23f   : > { %1474 = vmatpush.msra.mxu2 %v1473_v32  ;;  %1430 = vmatpush.msra.mxu0 %v1355_v44  ;;  %v1356_v46 = vsub.f32 %v1354_v35, %v1355_v44  ;;  %v1502_v6 = vsub.f32 %v1500_v26, %v1501_v36 }
 0x241   : > { %1576 = vmatpush.msrb.mxu2 %v1501_v36  ;;  %1527 = vmatpush.msrb.mxu0 %v1500_v26  ;;  %v1357_v48 = vand.u32 4294901760, %v1356_v46  ;;  %v1503_v16 = vand.u32 4294901760, %v1502_v6 }
 0x243   : > { %1358 = vmatpush.msrb.mxu1 %v1357_v48  ;;  %1504 = vmatpush.msra.mxu3 %v1503_v16 }
 0x244   : > { %1360 = vmatmul.f32.vlgmr.msrb.gmra.mxu1 %v2662_v49  ;;  %1432 = vmatmul.f32.vlgmr.msra.gmra.mxu0 %v2662_v49 }
 0x245   : > { %1598 = vmatpush.msrb.mxu3 %v1473_v32  ;;  %1452 = vmatpush.msra.mxu1 %v1327_v41 }
 0x246   : > { %1506 = vmatmul.f32.vlgmr.msra.gmra.mxu3 %v2662_v49  ;;  %1480 = vmatmul.f32.vlgmr.msra.gmra.mxu2 %v1333_v63 }
 0x247   : > { %1550 = vmatpush.msrb.mxu1 %v1473_v32 }
 0x24c   : > { %1454 = vmatmul.f32.vlgmr.msra.gmra.mxu1 %v2662_v49  ;;  %1530 = vmatmul.f32.vlgmr.msrb.gmra.mxu0 %v1330_v30 }
 0x24e   : > { %1600 = vmatmul.f32.vlgmr.msrb.gmra.mxu3 %v2662_v49  ;;  %1578 = vmatmul.f32.vlgmr.msrb.gmra.mxu2 %v2662_v49 }
 0x254   : > { %1554 = vmatmul.f32.vlgmr.msrb.gmra.mxu1 %v1331_v29 }
 0x292   : > { %v1298_v28 = vpop.permute.xlu0 %1297 }
 0x293   : > { %v1300_v42 = vperm.slane %v1298_v28, 0 }
 0x2b9   : > { %v1335_v2 = vpop.f32.mrf.mxu0 }
 0x2ba   : > { %v1336_v53 = vadd.f32 %v1335_v2, %v1300_v42 }
 0x2bf   : > { %v1409_v27 = vpop.f32.mrf.mxu3 }
 0x2c1   : > { %v1361_v60 = vpop.f32.mrf.mxu1  ;;  %v1385_v57 = vpop.f32.mrf.mxu2 }
 0x2c2   : > { %v1433_v23 = vpop.f32.mrf.mxu0  ;;  %v1362_v15 = vadd.f32 %v1361_v60, %v1336_v53 }
 0x2c4   : > { %v1386_v58 = vadd.f32 %v1385_v57, %v1362_v15 }
 0x2c6   : > { %v1410_v14 = vadd.f32 %v1409_v27, %v1386_v58 }
 0x2c8   : > { %v1434_v21 = vadd.f32 %v1433_v23, %v1410_v14 }
 0x2c9   : > { %v1455_v4 = vpop.f32.mrf.mxu1  ;;  %v1507_v33 = vpop.f32.mrf.mxu3 }
 0x2ca   : > { %v1481_v37 = vpop.f32.mrf.mxu2  ;;  %v1531_v45 = vpop.f32.mrf.mxu0  ;;  %v1456_v38 = vadd.f32 %v1455_v4, %v1434_v21 }
 0x2cb   : > { %v1482_v34 = vadd.f32 %v1481_v37, %v1300_v42 }
 0x2cd   : > { %v1508_v59 = vadd.f32 %v1507_v33, %v1482_v34 }
 0x2cf   : > { %v1532_v49 = vadd.f32 %v1531_v45, %v1508_v59 }
 0x2d1   : > { %v1555_v25 = vpop.f32.mrf.mxu1  ;;  %v1601_v31 = vpop.f32.mrf.mxu3 }
 0x2d2   : > { %v1556_v17 = vadd.f32 %v1555_v25, %v1532_v49  ;;  %v1579_v50 = vpop.f32.mrf.mxu2 }
 0x2d4   : > { %v1580_v30 = vadd.f32 %v1579_v50, %v1556_v17 }
 0x2d6   : > { %v1602_v5 = vadd.f32 %v1601_v31, %v1580_v30 }
 0x2d8   : > { %v1606_v47 = vrot.slane %v1602_v5, 7 }
 0x2da   : > { %v1608_v3 = vsel %vm1607_vm8, %v1456_v38, %v1606_v47 }
 0x2db   : > { %1614 = vst.msk [vmem:[%s398_s11] sm:$0x3] %vm1612_vm9, %v1608_v3 }
 0x2dc   : > { %1937 = shalt.err (!%p1934_p10)
}
 0x2dd   : > { %1733 = dma.vmem_to_hbm [thread:$0]  (%p2135_p3), %s1629_s13, 32, %s1631_s17, %s1616_s9  }
 0x2de PF: > { %s1642_s1 = sand.u32 1, %s1968_s15   ;;  %p2751_p12 = scmp.ge.s32.totalorder %s1980_s18, 2 }
 0x2df   : > { %s1643_s23 = scalar_lea.sflag [#allocation5], %s1642_s1 }
 0x2e0   : > { %p1744_p13 = pnand %p2751_p12, %p2101_p6 }
 0x2e2   : > { %p1745_p0 = pneg %p1744_p13 }
 0x2e4   : > { %1963 = dma.done.wait (%p1745_p0), %s1643_s23, 32  }
 0x2e5   : > { %1965 = vsyncadd (%p1745_p0), %s1643_s23, 4294967264  ;;  %s2752_s26 = sld [smem:[#allocation12_spill]]  ;;  %p26_p5 = scmp.ge.s32.totalorder %s2119_s28, 4  }
 0x2e6   : > { %s2753_s17 = sld [smem:[#allocation13_spill]]  ;;  %s2754_s15 = smov %s1972_s16 }
 0x2e7   : > { %s2756_s18 = smov %s2119_s28  ;;  %28 = sbr.rel (!%p26_p5) target bundleno = 9 (0x9), region = 109 }
 0x2eb   : > { %s2755_s16 = smov %s2752_s26 }
 0x2ec   :  { %1649 = vsyncpa [#allocation4], 1 }
 0x2ed   :  { %1651 = vsyncpa [#allocation4 + $0x1], 1 }
 0x2ee   :  { %1652 = vsyncpa [#allocation7], 1 }
 0x2ef   :  { %1653 = vsyncpa [#allocation5], 1 }
 0x2f0   :  { %1655 = vsyncpa [#allocation5 + $0x1], 1 }

</bundles_post_ra>
